<compile_context>
chip_gen: v7x
topology: tpu7x:2x2x1
jax: 0.10.0
libtpu: 0.0.40
codegen_flags: <defaults>
</compile_context>

<pallas_src>
import functools

import numpy as np

import jax
import jax.numpy as jnp
from jax.experimental import pallas as pl
from jax.experimental.pallas import tpu as pltpu


# --------------------------- in-kernel building blocks ---------------------- #

def _lane_shift(v, d):
    """out[:, i] = v[:, (i + d) % n]  (XLU lane rotation; pltpu.roll == jnp.roll)."""
    n = v.shape[-1]
    s = (-d) % n
    if s == 0:
        return v
    return pltpu.roll(v, s, axis=1)


def _conv3x3_same_relu(act, w_t, mask, w_img):
    """3x3 'same' conv + ReLU on a lane-packed, channel-major feature map.

    act:  (Cin, L)       L = B*h*w, lane = b*h*w + y*w_img + x
    w_t:  (Cout, 9*Cin)  tap-major, channel-minor (matches im2col row order)
    mask: (9*Cin, L)     precomputed 0/1 'same'-padding validity per tap/lane
    """
    taps = []
    for dy in range(3):
        for dx in range(3):
            taps.append(_lane_shift(act, (dy - 1) * w_img + (dx - 1)))
    im2col = jnp.concatenate(taps, axis=0) * mask              # (9*Cin, L)
    out = jnp.dot(w_t, im2col, preferred_element_type=jnp.float32)
    return jnp.maximum(out, 0.0)


def _maxpool2x2(act, sel, w_img):
    """2x2/stride-2 max pool: lane-shift maxima + precomputed decimation matmul."""
    m = act
    for d in (1, w_img, w_img + 1):
        m = jnp.maximum(m, _lane_shift(act, d))
    return jnp.dot(m, sel, preferred_element_type=jnp.float32)


def _tconv2x2_stride2(act, w_taps_ref, scatter):
    """Transposed conv (kernel 2, stride 2, no bias).

    act: (Cin, L_in); w_taps_ref: (4, Cout, Cin) with tap t = ky*2 + kx;
    scatter: (4*L_in, L_out) precomputed 0/1 placement matrix.
    """
    z = jnp.concatenate(
        [jnp.dot(w_taps_ref[t], act, preferred_element_type=jnp.float32)
         for t in range(4)], axis=1)                           # (Cout, 4*L_in)
    return jnp.dot(z, scatter, preferred_element_type=jnp.float32)


# ------------------------------- fused kernel ------------------------------- #

def _autoencoder_kernel(x_ref, w1_ref, w2_ref, w3_ref, w4_ref,
                        m1_ref, m2_ref, sel1_ref, sel2_ref, sc1_ref, sc2_ref,
                        o_ref, *, W):
    x = x_ref[0].astype(jnp.float32)                               # (Cin_p, B*HW)

    y1 = _conv3x3_same_relu(x, w1_ref[...], m1_ref[...], W)        # (16, B*HW)
    p1 = _maxpool2x2(y1, sel1_ref[...], W)                         # (16, B*HW/4)
    y2 = _conv3x3_same_relu(p1, w2_ref[...], m2_ref[...], W // 2)  # (4,  B*HW/4)
    p2 = _maxpool2x2(y2, sel2_ref[...], W // 2)                    # (4,  B*HW/16)
    t1 = jnp.maximum(
        _tconv2x2_stride2(p2, w3_ref, sc1_ref[...]), 0.0)          # (16, B*HW/4)
    t2 = _tconv2x2_stride2(t1, w4_ref, sc2_ref[...])               # (Cout, B*HW)

    # numerically stable sigmoid: exp on the EUP, approximate reciprocal (vrcp)
    z = jnp.exp(-jnp.abs(t2))
    r = pl.reciprocal(1.0 + z, approx=True)
    sig = jnp.where(t2 >= 0.0, r, z * r)
    o_ref[0] = jnp.clip(sig, 0.0, 1.0).astype(o_ref.dtype)


# -------------------- host-side constant (mask/scatter) builders ------------ #

def _conv3x3_masks(h, w, cin, b):
    """(9*cin, b*h*w) 0/1 validity mask for the 9 'same'-conv taps, tap-major."""
    hw = h * w
    hh, ww = np.divmod(np.arange(hw), w)
    rows = []
    for dy in range(3):
        for dx in range(3):
            oy, ox = dy - 1, dx - 1
            valid = ((hh + oy >= 0) & (hh + oy < h) &
                     (ww + ox >= 0) & (ww + ox < w))
            rows.append(np.repeat(valid[None, :], cin, axis=0))
    m = np.concatenate(rows, axis=0).astype(np.float32)            # (9*cin, hw)
    return np.tile(m, (1, b))                                      # (9*cin, b*hw)


def _pool_decimation(h, w, b):
    """(b*h*w, b*(h//2)*(w//2)) 0/1 matrix keeping lanes at even (row, col)."""
    hw, hw_o = h * w, (h // 2) * (w // 2)
    q = np.arange(hw)
    r = np.arange(hw_o)
    keep = 2 * (r // (w // 2)) * w + 2 * (r % (w // 2))
    s = (q[:, None] == keep[None, :]).astype(np.float32)           # (hw, hw_o)
    return np.kron(np.eye(b, dtype=np.float32), s)                 # block-diag over images


def _tconv_scatter(h, w, b):
    """(4*b*h*w, b*4*h*w) combined scatter: tap t at rows t*(b*h*w) + lane,
    placing input (i, j) at fine-grid position (2i+ky, 2j+kx)."""
    n_in, w_fine = h * w, 2 * w
    q = np.arange(n_in)
    qi, qj = np.divmod(q, w)
    blocks = []
    for ky in range(2):
        for kx in range(2):
            dst = (2 * qi + ky) * w_fine + 2 * qj + kx
            s = np.zeros((n_in, 4 * n_in), np.float32)
            s[q, dst] = 1.0
            blocks.append(np.kron(np.eye(b, dtype=np.float32), s))
    return np.concatenate(blocks, axis=0)


# ------------------------------ host-side wrapper ---------------------------- #

def _cost_estimate(N, B, cin, cout, H, W):
    hw = H * W
    l1, l2, l3 = B * hw, (B * hw) // 4, (B * hw) // 16
    steps = N // B
    matmul_flops = 2 * (
        16 * 9 * cin * l1                  # conv1 im2col matmul
        + 16 * l1 * l2                     # pool1 decimation
        + 4 * 9 * 16 * l2                  # conv2
        + 4 * l2 * l3                      # pool2 decimation
        + 4 * 16 * 4 * l3 + 16 * 4 * l3 * l2       # t_conv1 taps + scatter
        + 4 * cout * 16 * l2 + cout * 4 * l2 * l1  # t_conv2 taps + scatter
    )
    return pl.CostEstimate(
        flops=steps * matmul_flops,
        transcendentals=steps * cout * l1,
        bytes_accessed=4 * (N * cin * hw + N * cout * hw))


def conv_autoencoder(x_nchw, params):
    """x_nchw: (N, Cin, H, W) float32 -> (N, Cout, H, W) float32 in [0, 1]."""
    w1, w2, w3, w4 = params
    N, Cin, H, W = x_nchw.shape
    Cout = w4.shape[-1]
    assert H % 4 == 0 and W % 4 == 0, "two 2x2 pools need H, W divisible by 4"
    HW = H * W

    # Pack B images along the lane axis per grid step (amortizes per-step
    # overhead; keeps rolled/stored lane widths at multiples of 128 for the
    # benchmark shape).  On v7x with large batches the remaining grid still
    # splits across both TensorCores via dimension_semantics=("parallel",).
    B = 1
    for cand in range(min(N, max(1, 512 // HW)), 0, -1):
        if N % cand == 0:
            B = cand
            break
    G = N // B

    # Pad input channels to a multiple of 8 so the im2col sublane concat is
    # tile-aligned (padded channels are all-zero in both x and w1).
    Cin_p = -(-Cin // 8) * 8

    # ---- free/cheap layout plumbing outside the kernel ----
    x_cm = jnp.transpose(x_nchw.reshape(G, B, Cin, HW), (0, 2, 1, 3))
    x_cm = x_cm.reshape(G, Cin, B * HW)
    x_cm = jnp.pad(x_cm, ((0, 0), (0, Cin_p - Cin), (0, 0)))

    w1t = jnp.pad(w1, ((0, 0), (0, 0), (0, Cin_p - Cin), (0, 0))
                  ).reshape(9 * Cin_p, 16).T                       # (16, 9*Cin_p)
    w2t = w2.reshape(9 * 16, 4).T                                  # (4, 144)
    w3t = jnp.transpose(w3, (0, 1, 3, 2)).reshape(4, 16, 4)        # (tap, 16, 4)
    w4t = jnp.transpose(w4, (0, 1, 3, 2)).reshape(4, Cout, 16)     # (tap, Cout, 16)

    # ---- grid-invariant constants, precomputed on the host (numpy) ----
    m1 = _conv3x3_masks(H, W, Cin_p, B)                            # (9*Cin_p, B*HW)
    m2 = _conv3x3_masks(H // 2, W // 2, 16, B)                     # (144, B*HW/4)
    sel1 = _pool_decimation(H, W, B)                               # (B*HW, B*HW/4)
    sel2 = _pool_decimation(H // 2, W // 2, B)                     # (B*HW/4, B*HW/16)
    sc1 = _tconv_scatter(H // 4, W // 4, B)                        # (4*B*HW/16, B*HW/4)
    sc2 = _tconv_scatter(H // 2, W // 2, B)                        # (4*B*HW/4, B*HW)

    def const(arr):
        nd = arr.ndim
        return pl.BlockSpec(tuple(arr.shape), lambda n, _nd=nd: (0,) * _nd)

    kernel = functools.partial(_autoencoder_kernel, W=W)
    out = pl.pallas_call(
        kernel,
        out_shape=jax.ShapeDtypeStruct((G, Cout, B * HW), x_nchw.dtype),
        grid=(G,),
        in_specs=[
            pl.BlockSpec((1, Cin_p, B * HW), lambda n: (n, 0, 0)),
            const(w1t), const(w2t), const(w3t), const(w4t),
            const(m1), const(m2), const(sel1), const(sel2), const(sc1), const(sc2),
        ],
        out_specs=pl.BlockSpec((1, Cout, B * HW), lambda n: (n, 0, 0)),
        compiler_params=pltpu.CompilerParams(
            dimension_semantics=("parallel",)),
        cost_estimate=_cost_estimate(N, B, Cin_p, Cout, H, W),
    )(x_cm, w1t, w2t, w3t, w4t, m1, m2, sel1, sel2, sc1, sc2)

    out = jnp.transpose(out.reshape(G, Cout, B, HW), (0, 2, 1, 3))
    return out.reshape(N, Cout, H, W)


# ------------------------------ reference (pure JAX) ------------------------- #

def _reference_forward(x, params):
    """Dense pure-JAX reference of the same forward pass."""
    w1, w2, w3, w4 = params

    def conv(h, w):
        return jax.lax.conv_general_dilated(
            h, w, window_strides=(1, 1), padding="SAME",
            dimension_numbers=("NCHW", "HWIO", "NCHW"))

    def pool(h):
        return jax.lax.reduce_window(h, -jnp.inf, jax.lax.max,
                                     (1, 1, 2, 2), (1, 1, 2, 2), "VALID")

    def tconv(h, w):
        n, _, hh, ww = h.shape
        cout = w.shape[-1]
        out = jnp.zeros((n, cout, 2 * hh, 2 * ww), jnp.float32)
        for ky in range(2):
            for kx in range(2):
                contrib = jnp.einsum("nchw,cd->ndhw", h, w[ky, kx])
                out = out.at[:, :, ky::2, kx::2].set(contrib)
        return out

    h = jax.nn.relu(conv(x, w1))
    h = pool(h)
    h = jax.nn.relu(conv(h, w2))
    h = pool(h)
    h = jax.nn.relu(tconv(h, w3))
    return jax.nn.sigmoid(tconv(h, w4))


# ------------------------------ parameters ----------------------------------- #

def _xavier_normal(key, shape, fan_in, fan_out):
    std = (2.0 / (fan_in + fan_out)) ** 0.5
    return std * jax.random.normal(key, shape, dtype=jnp.float32)


def init_params(key, in_channel, out_channel):
    k1, k2, k3, k4 = jax.random.split(key, 4)
    w1 = _xavier_normal(k1, (3, 3, in_channel, 16), in_channel * 9, 16 * 9)
    w2 = _xavier_normal(k2, (3, 3, 16, 4), 16 * 9, 4 * 9)
    w3 = _xavier_normal(k3, (2, 2, 4, 16), 4 * 4, 16 * 4)
    w4 = _xavier_normal(k4, (2, 2, 16, out_channel), 16 * 4, out_channel * 4)
    return w1, w2, w3, w4


if __name__ == "__main__":
    key = jax.random.PRNGKey(0)
    kx, kp = jax.random.split(key)

    in_channel, out_channel = 4, 4                   # D = 2 (2-D conv)
    x = jax.random.normal(kx, (2, in_channel, 16, 16), dtype=jnp.float32)
    params = init_params(kp, in_channel, out_channel)

    y = jax.jit(conv_autoencoder)(x, params)
    jax.block_until_ready(y)

    assert y.shape == (2, out_channel, 16, 16), y.shape
    assert bool(jnp.all((y >= 0.0) & (y <= 1.0)))    # sigmoid output range

    # pure-JAX reference check (tolerance covers default-precision MXU matmuls
    # and the approximate reciprocal inside the in-kernel sigmoid)
    y_ref = _reference_forward(x, params)
    max_err = float(jnp.max(jnp.abs(y - y_ref)))
    assert max_err < 2e-2, f"kernel/reference mismatch: {max_err}"

    print("KERNEL_OK")
</pallas_src>

<mosaic_0001>
module attributes {stable_mosaic.version = 11 : i64} {
  func.func @_autoencoder_kernel(%arg0: i32, %arg1: memref<1x8x512xf32, #tpu.memory_space<vmem>>, %arg2: memref<16x72xf32, #tpu.memory_space<vmem>>, %arg3: memref<4x144xf32, #tpu.memory_space<vmem>>, %arg4: memref<4x16x4xf32, #tpu.memory_space<vmem>>, %arg5: memref<4x4x16xf32, #tpu.memory_space<vmem>>, %arg6: memref<72x512xf32, #tpu.memory_space<vmem>>, %arg7: memref<144x128xf32, #tpu.memory_space<vmem>>, %arg8: memref<512x128xf32, #tpu.memory_space<vmem>>, %arg9: memref<128x32xf32, #tpu.memory_space<vmem>>, %arg10: memref<128x128xf32, #tpu.memory_space<vmem>>, %arg11: memref<512x512xf32, #tpu.memory_space<vmem>>, %arg12: memref<1x4x512xf32, #tpu.memory_space<vmem>>) attributes {dimension_semantics = [#tpu.dimension_semantics<parallel>], iteration_bounds = array<i64: 1>, scalar_prefetch = 0 : i64, scratch_operands = 0 : i64, tpu.core_type = #tpu.core_type<tc>, window_params = [{transform_indices = @transform_0, window_bounds = array<i64: 1, 8, 512>}, {pipeline_mode = #tpu.pipeline_mode<synchronous>, transform_indices = @transform_1, window_bounds = array<i64: 16, 72>}, {pipeline_mode = #tpu.pipeline_mode<synchronous>, transform_indices = @transform_2, window_bounds = array<i64: 4, 144>}, {pipeline_mode = #tpu.pipeline_mode<synchronous>, transform_indices = @transform_3, window_bounds = array<i64: 4, 16, 4>}, {pipeline_mode = #tpu.pipeline_mode<synchronous>, transform_indices = @transform_4, window_bounds = array<i64: 4, 4, 16>}, {pipeline_mode = #tpu.pipeline_mode<synchronous>, transform_indices = @transform_5, window_bounds = array<i64: 72, 512>}, {pipeline_mode = #tpu.pipeline_mode<synchronous>, transform_indices = @transform_6, window_bounds = array<i64: 144, 128>}, {pipeline_mode = #tpu.pipeline_mode<synchronous>, transform_indices = @transform_7, window_bounds = array<i64: 512, 128>}, {pipeline_mode = #tpu.pipeline_mode<synchronous>, transform_indices = @transform_8, window_bounds = array<i64: 128, 32>}, {pipeline_mode = #tpu.pipeline_mode<synchronous>, transform_indices = @transform_9, window_bounds = array<i64: 128, 128>}, {pipeline_mode = #tpu.pipeline_mode<synchronous>, transform_indices = @transform_10, window_bounds = array<i64: 512, 512>}, {transform_indices = @transform_11, window_bounds = array<i64: 1, 4, 512>}]} {
    %c0 = arith.constant 0 : index
    %c0_0 = arith.constant 0 : index
    %c0_1 = arith.constant 0 : index
    %0 = vector.load %arg1[%c0, %c0_0, %c0_1] : memref<1x8x512xf32, #tpu.memory_space<vmem>>, vector<1x8x512xf32>
    %1 = vector.shape_cast %0 : vector<1x8x512xf32> to vector<8x512xf32>
    %c0_2 = arith.constant 0 : index
    %c0_3 = arith.constant 0 : index
    %2 = vector.load %arg2[%c0_2, %c0_3] : memref<16x72xf32, #tpu.memory_space<vmem>>, vector<16x72xf32>
    %c0_4 = arith.constant 0 : index
    %c0_5 = arith.constant 0 : index
    %3 = vector.load %arg6[%c0_4, %c0_5] : memref<72x512xf32, #tpu.memory_space<vmem>>, vector<72x512xf32>
    %c17_i32 = arith.constant 17 : i32
    %4 = tpu.dynamic_rotate %1 by %c17_i32 dim 1 : vector<8x512xf32>, i32 -> vector<8x512xf32>
    %c16_i32 = arith.constant 16 : i32
    %5 = tpu.dynamic_rotate %1 by %c16_i32 dim 1 : vector<8x512xf32>, i32 -> vector<8x512xf32>
    %c15_i32 = arith.constant 15 : i32
    %6 = tpu.dynamic_rotate %1 by %c15_i32 dim 1 : vector<8x512xf32>, i32 -> vector<8x512xf32>
    %c1_i32 = arith.constant 1 : i32
    %7 = tpu.dynamic_rotate %1 by %c1_i32 dim 1 : vector<8x512xf32>, i32 -> vector<8x512xf32>
    %c511_i32 = arith.constant 511 : i32
    %8 = tpu.dynamic_rotate %1 by %c511_i32 dim 1 : vector<8x512xf32>, i32 -> vector<8x512xf32>
    %c497_i32 = arith.constant 497 : i32
    %9 = tpu.dynamic_rotate %1 by %c497_i32 dim 1 : vector<8x512xf32>, i32 -> vector<8x512xf32>
    %c496_i32 = arith.constant 496 : i32
    %10 = tpu.dynamic_rotate %1 by %c496_i32 dim 1 : vector<8x512xf32>, i32 -> vector<8x512xf32>
    %c495_i32 = arith.constant 495 : i32
    %11 = tpu.dynamic_rotate %1 by %c495_i32 dim 1 : vector<8x512xf32>, i32 -> vector<8x512xf32>
    %12 = tpu.concatenate %4, %5, %6, %7, %1, %8, %9, %10, %11 in 0 : vector<8x512xf32>, vector<8x512xf32>, vector<8x512xf32>, vector<8x512xf32>, vector<8x512xf32>, vector<8x512xf32>, vector<8x512xf32>, vector<8x512xf32>, vector<8x512xf32> -> vector<72x512xf32>
    %13 = arith.mulf %12, %3 : vector<72x512xf32>
    %cst = arith.constant dense<0.000000e+00> : vector<16x512xf32>
    %14 = tpu.matmul %2, %13, %cst {dimension_numbers = #tpu.dot_dimension_numbers<[1], [0], [0], [1], [0, 0, 1, 1], [], []>} : vector<16x72xf32>, vector<72x512xf32>, vector<16x512xf32> -> vector<16x512xf32>
    %cst_6 = arith.constant 0.000000e+00 : f32
    %15 = vector.broadcast %cst_6 : f32 to vector<16x512xf32>
    %16 = arith.maximumf %14, %15 : vector<16x512xf32>
    %c0_7 = arith.constant 0 : index
    %c0_8 = arith.constant 0 : index
    %17 = vector.load %arg8[%c0_7, %c0_8] : memref<512x128xf32, #tpu.memory_space<vmem>>, vector<512x128xf32>
    %c511_i32_9 = arith.constant 511 : i32
    %18 = tpu.dynamic_rotate %16 by %c511_i32_9 dim 1 : vector<16x512xf32>, i32 -> vector<16x512xf32>
    %19 = arith.maximumf %16, %18 : vector<16x512xf32>
    %c496_i32_10 = arith.constant 496 : i32
    %20 = tpu.dynamic_rotate %16 by %c496_i32_10 dim 1 : vector<16x512xf32>, i32 -> vector<16x512xf32>
    %21 = arith.maximumf %19, %20 : vector<16x512xf32>
    %c495_i32_11 = arith.constant 495 : i32
    %22 = tpu.dynamic_rotate %16 by %c495_i32_11 dim 1 : vector<16x512xf32>, i32 -> vector<16x512xf32>
    %23 = arith.maximumf %21, %22 : vector<16x512xf32>
    %cst_12 = arith.constant dense<0.000000e+00> : vector<16x128xf32>
    %24 = tpu.matmul %23, %17, %cst_12 {dimension_numbers = #tpu.dot_dimension_numbers<[1], [0], [0], [1], [0, 0, 1, 1], [], []>} : vector<16x512xf32>, vector<512x128xf32>, vector<16x128xf32> -> vector<16x128xf32>
    %c0_13 = arith.constant 0 : index
    %c0_14 = arith.constant 0 : index
    %25 = vector.load %arg3[%c0_13, %c0_14] : memref<4x144xf32, #tpu.memory_space<vmem>>, vector<4x144xf32>
    %c0_15 = arith.constant 0 : index
    %c0_16 = arith.constant 0 : index
    %26 = vector.load %arg7[%c0_15, %c0_16] : memref<144x128xf32, #tpu.memory_space<vmem>>, vector<144x128xf32>
    %c9_i32 = arith.constant 9 : i32
    %27 = tpu.dynamic_rotate %24 by %c9_i32 dim 1 : vector<16x128xf32>, i32 -> vector<16x128xf32>
    %c8_i32 = arith.constant 8 : i32
    %28 = tpu.dynamic_rotate %24 by %c8_i32 dim 1 : vector<16x128xf32>, i32 -> vector<16x128xf32>
    %c7_i32 = arith.constant 7 : i32
    %29 = tpu.dynamic_rotate %24 by %c7_i32 dim 1 : vector<16x128xf32>, i32 -> vector<16x128xf32>
    %c1_i32_17 = arith.constant 1 : i32
    %30 = tpu.dynamic_rotate %24 by %c1_i32_17 dim 1 : vector<16x128xf32>, i32 -> vector<16x128xf32>
    %c127_i32 = arith.constant 127 : i32
    %31 = tpu.dynamic_rotate %24 by %c127_i32 dim 1 : vector<16x128xf32>, i32 -> vector<16x128xf32>
    %c121_i32 = arith.constant 121 : i32
    %32 = tpu.dynamic_rotate %24 by %c121_i32 dim 1 : vector<16x128xf32>, i32 -> vector<16x128xf32>
    %c120_i32 = arith.constant 120 : i32
    %33 = tpu.dynamic_rotate %24 by %c120_i32 dim 1 : vector<16x128xf32>, i32 -> vector<16x128xf32>
    %c119_i32 = arith.constant 119 : i32
    %34 = tpu.dynamic_rotate %24 by %c119_i32 dim 1 : vector<16x128xf32>, i32 -> vector<16x128xf32>
    %35 = tpu.concatenate %27, %28, %29, %30, %24, %31, %32, %33, %34 in 0 : vector<16x128xf32>, vector<16x128xf32>, vector<16x128xf32>, vector<16x128xf32>, vector<16x128xf32>, vector<16x128xf32>, vector<16x128xf32>, vector<16x128xf32>, vector<16x128xf32> -> vector<144x128xf32>
    %36 = arith.mulf %35, %26 : vector<144x128xf32>
    %cst_18 = arith.constant dense<0.000000e+00> : vector<4x128xf32>
    %37 = tpu.matmul %25, %36, %cst_18 {dimension_numbers = #tpu.dot_dimension_numbers<[1], [0], [0], [1], [0, 0, 1, 1], [], []>} : vector<4x144xf32>, vector<144x128xf32>, vector<4x128xf32> -> vector<4x128xf32>
    %cst_19 = arith.constant 0.000000e+00 : f32
    %38 = vector.broadcast %cst_19 : f32 to vector<4x128xf32>
    %39 = arith.maximumf %37, %38 : vector<4x128xf32>
    %c0_20 = arith.constant 0 : index
    %c0_21 = arith.constant 0 : index
    %40 = vector.load %arg9[%c0_20, %c0_21] : memref<128x32xf32, #tpu.memory_space<vmem>>, vector<128x32xf32>
    %c127_i32_22 = arith.constant 127 : i32
    %41 = tpu.dynamic_rotate %39 by %c127_i32_22 dim 1 : vector<4x128xf32>, i32 -> vector<4x128xf32>
    %42 = arith.maximumf %39, %41 : vector<4x128xf32>
    %c120_i32_23 = arith.constant 120 : i32
    %43 = tpu.dynamic_rotate %39 by %c120_i32_23 dim 1 : vector<4x128xf32>, i32 -> vector<4x128xf32>
    %44 = arith.maximumf %42, %43 : vector<4x128xf32>
    %c119_i32_24 = arith.constant 119 : i32
    %45 = tpu.dynamic_rotate %39 by %c119_i32_24 dim 1 : vector<4x128xf32>, i32 -> vector<4x128xf32>
    %46 = arith.maximumf %44, %45 : vector<4x128xf32>
    %cst_25 = arith.constant dense<0.000000e+00> : vector<4x32xf32>
    %47 = tpu.matmul %46, %40, %cst_25 {dimension_numbers = #tpu.dot_dimension_numbers<[1], [0], [0], [1], [0, 0, 1, 1], [], []>} : vector<4x128xf32>, vector<128x32xf32>, vector<4x32xf32> -> vector<4x32xf32>
    %c0_26 = arith.constant 0 : index
    %c0_27 = arith.constant 0 : index
    %48 = vector.load %arg10[%c0_26, %c0_27] : memref<128x128xf32, #tpu.memory_space<vmem>>, vector<128x128xf32>
    %c0_28 = arith.constant 0 : index
    %c0_29 = arith.constant 0 : index
    %c0_30 = arith.constant 0 : index
    %49 = vector.load %arg4[%c0_28, %c0_29, %c0_30] : memref<4x16x4xf32, #tpu.memory_space<vmem>>, vector<1x16x4xf32>
    %50 = vector.shape_cast %49 : vector<1x16x4xf32> to vector<16x4xf32>
    %cst_31 = arith.constant dense<0.000000e+00> : vector<16x32xf32>
    %51 = tpu.matmul %50, %47, %cst_31 {dimension_numbers = #tpu.dot_dimension_numbers<[1], [0], [0], [1], [0, 0, 1, 1], [], []>} : vector<16x4xf32>, vector<4x32xf32>, vector<16x32xf32> -> vector<16x32xf32>
    %c1 = arith.constant 1 : index
    %c0_32 = arith.constant 0 : index
    %c0_33 = arith.constant 0 : index
    %52 = vector.load %arg4[%c1, %c0_32, %c0_33] : memref<4x16x4xf32, #tpu.memory_space<vmem>>, vector<1x16x4xf32>
    %53 = vector.shape_cast %52 : vector<1x16x4xf32> to vector<16x4xf32>
    %cst_34 = arith.constant dense<0.000000e+00> : vector<16x32xf32>
    %54 = tpu.matmul %53, %47, %cst_34 {dimension_numbers = #tpu.dot_dimension_numbers<[1], [0], [0], [1], [0, 0, 1, 1], [], []>} : vector<16x4xf32>, vector<4x32xf32>, vector<16x32xf32> -> vector<16x32xf32>
    %c2 = arith.constant 2 : index
    %c0_35 = arith.constant 0 : index
    %c0_36 = arith.constant 0 : index
    %55 = vector.load %arg4[%c2, %c0_35, %c0_36] : memref<4x16x4xf32, #tpu.memory_space<vmem>>, vector<1x16x4xf32>
    %56 = vector.shape_cast %55 : vector<1x16x4xf32> to vector<16x4xf32>
    %cst_37 = arith.constant dense<0.000000e+00> : vector<16x32xf32>
    %57 = tpu.matmul %56, %47, %cst_37 {dimension_numbers = #tpu.dot_dimension_numbers<[1], [0], [0], [1], [0, 0, 1, 1], [], []>} : vector<16x4xf32>, vector<4x32xf32>, vector<16x32xf32> -> vector<16x32xf32>
    %c3 = arith.constant 3 : index
    %c0_38 = arith.constant 0 : index
    %c0_39 = arith.constant 0 : index
    %58 = vector.load %arg4[%c3, %c0_38, %c0_39] : memref<4x16x4xf32, #tpu.memory_space<vmem>>, vector<1x16x4xf32>
    %59 = vector.shape_cast %58 : vector<1x16x4xf32> to vector<16x4xf32>
    %cst_40 = arith.constant dense<0.000000e+00> : vector<16x32xf32>
    %60 = tpu.matmul %59, %47, %cst_40 {dimension_numbers = #tpu.dot_dimension_numbers<[1], [0], [0], [1], [0, 0, 1, 1], [], []>} : vector<16x4xf32>, vector<4x32xf32>, vector<16x32xf32> -> vector<16x32xf32>
    %61 = tpu.concatenate %51, %54, %57, %60 in 1 : vector<16x32xf32>, vector<16x32xf32>, vector<16x32xf32>, vector<16x32xf32> -> vector<16x128xf32>
    %cst_41 = arith.constant dense<0.000000e+00> : vector<16x128xf32>
    %62 = tpu.matmul %61, %48, %cst_41 {dimension_numbers = #tpu.dot_dimension_numbers<[1], [0], [0], [1], [0, 0, 1, 1], [], []>} : vector<16x128xf32>, vector<128x128xf32>, vector<16x128xf32> -> vector<16x128xf32>
    %cst_42 = arith.constant 0.000000e+00 : f32
    %63 = vector.broadcast %cst_42 : f32 to vector<16x128xf32>
    %64 = arith.maximumf %62, %63 : vector<16x128xf32>
    %c0_43 = arith.constant 0 : index
    %c0_44 = arith.constant 0 : index
    %65 = vector.load %arg11[%c0_43, %c0_44] : memref<512x512xf32, #tpu.memory_space<vmem>>, vector<512x512xf32>
    %c0_45 = arith.constant 0 : index
    %c0_46 = arith.constant 0 : index
    %c0_47 = arith.constant 0 : index
    %66 = vector.load %arg5[%c0_45, %c0_46, %c0_47] : memref<4x4x16xf32, #tpu.memory_space<vmem>>, vector<1x4x16xf32>
    %67 = vector.shape_cast %66 : vector<1x4x16xf32> to vector<4x16xf32>
    %cst_48 = arith.constant dense<0.000000e+00> : vector<4x128xf32>
    %68 = tpu.matmul %67, %64, %cst_48 {dimension_numbers = #tpu.dot_dimension_numbers<[1], [0], [0], [1], [0, 0, 1, 1], [], []>} : vector<4x16xf32>, vector<16x128xf32>, vector<4x128xf32> -> vector<4x128xf32>
    %c1_49 = arith.constant 1 : index
    %c0_50 = arith.constant 0 : index
    %c0_51 = arith.constant 0 : index
    %69 = vector.load %arg5[%c1_49, %c0_50, %c0_51] : memref<4x4x16xf32, #tpu.memory_space<vmem>>, vector<1x4x16xf32>
    %70 = vector.shape_cast %69 : vector<1x4x16xf32> to vector<4x16xf32>
    %cst_52 = arith.constant dense<0.000000e+00> : vector<4x128xf32>
    %71 = tpu.matmul %70, %64, %cst_52 {dimension_numbers = #tpu.dot_dimension_numbers<[1], [0], [0], [1], [0, 0, 1, 1], [], []>} : vector<4x16xf32>, vector<16x128xf32>, vector<4x128xf32> -> vector<4x128xf32>
    %c2_53 = arith.constant 2 : index
    %c0_54 = arith.constant 0 : index
    %c0_55 = arith.constant 0 : index
    %72 = vector.load %arg5[%c2_53, %c0_54, %c0_55] : memref<4x4x16xf32, #tpu.memory_space<vmem>>, vector<1x4x16xf32>
    %73 = vector.shape_cast %72 : vector<1x4x16xf32> to vector<4x16xf32>
    %cst_56 = arith.constant dense<0.000000e+00> : vector<4x128xf32>
    %74 = tpu.matmul %73, %64, %cst_56 {dimension_numbers = #tpu.dot_dimension_numbers<[1], [0], [0], [1], [0, 0, 1, 1], [], []>} : vector<4x16xf32>, vector<16x128xf32>, vector<4x128xf32> -> vector<4x128xf32>
    %c3_57 = arith.constant 3 : index
    %c0_58 = arith.constant 0 : index
    %c0_59 = arith.constant 0 : index
    %75 = vector.load %arg5[%c3_57, %c0_58, %c0_59] : memref<4x4x16xf32, #tpu.memory_space<vmem>>, vector<1x4x16xf32>
    %76 = vector.shape_cast %75 : vector<1x4x16xf32> to vector<4x16xf32>
    %cst_60 = arith.constant dense<0.000000e+00> : vector<4x128xf32>
    %77 = tpu.matmul %76, %64, %cst_60 {dimension_numbers = #tpu.dot_dimension_numbers<[1], [0], [0], [1], [0, 0, 1, 1], [], []>} : vector<4x16xf32>, vector<16x128xf32>, vector<4x128xf32> -> vector<4x128xf32>
    %78 = tpu.concatenate %68, %71, %74, %77 in 1 : vector<4x128xf32>, vector<4x128xf32>, vector<4x128xf32>, vector<4x128xf32> -> vector<4x512xf32>
    %cst_61 = arith.constant dense<0.000000e+00> : vector<4x512xf32>
    %79 = tpu.matmul %78, %65, %cst_61 {dimension_numbers = #tpu.dot_dimension_numbers<[1], [0], [0], [1], [0, 0, 1, 1], [], []>} : vector<4x512xf32>, vector<512x512xf32>, vector<4x512xf32> -> vector<4x512xf32>
    %80 = math.absf %79 : vector<4x512xf32>
    %cst_62 = arith.constant 0.000000e+00 : f32
    %81 = vector.broadcast %cst_62 : f32 to vector<4x512xf32>
    %82 = arith.subf %81, %80 : vector<4x512xf32>
    %83 = math.exp %82 : vector<4x512xf32>
    %cst_63 = arith.constant 1.000000e+00 : f32
    %84 = vector.broadcast %cst_63 : f32 to vector<4x512xf32>
    %85 = arith.addf %84, %83 : vector<4x512xf32>
    %86 = tpu.reciprocal %85 {approx = true} : vector<4x512xf32> -> vector<4x512xf32>
    %cst_64 = arith.constant 0.000000e+00 : f32
    %87 = vector.broadcast %cst_64 : f32 to vector<4x512xf32>
    %88 = arith.cmpf oge, %79, %87 : vector<4x512xf32>
    %89 = arith.mulf %83, %86 : vector<4x512xf32>
    %90 = arith.select %88, %86, %89 : vector<4x512xi1>, vector<4x512xf32>
    %cst_65 = arith.constant 0.000000e+00 : f32
    %cst_66 = arith.constant 1.000000e+00 : f32
    %91 = vector.broadcast %cst_65 : f32 to vector<4x512xf32>
    %92 = arith.maximumf %91, %90 : vector<4x512xf32>
    %93 = vector.broadcast %cst_66 : f32 to vector<4x512xf32>
    %94 = arith.minimumf %93, %92 : vector<4x512xf32>
    %c0_67 = arith.constant 0 : index
    %c0_68 = arith.constant 0 : index
    %c0_69 = arith.constant 0 : index
    %95 = vector.load %arg12[%c0_67, %c0_68, %c0_69] : memref<1x4x512xf32, #tpu.memory_space<vmem>>, vector<1x4x512xf32>
    %96 = vector.shape_cast %95 : vector<1x4x512xf32> to vector<4x512xf32>
    %97 = vector.shape_cast %94 : vector<4x512xf32> to vector<1x4x512xf32>
    tpu.vector_store %arg12[%c0_67, %c0_68, %c0_69], %97 {strides = array<i32>} : memref<1x4x512xf32, #tpu.memory_space<vmem>>, vector<1x4x512xf32>,
    return
  }
  func.func @transform_0(%arg0: i32) -> (i32, i32, i32) {
    %c0_i32 = arith.constant 0 : i32
    %c0_i32_0 = arith.constant 0 : i32
    %c0_i32_1 = arith.constant 0 : i32
    return %arg0, %c0_i32, %c0_i32_0 : i32, i32, i32
  }
  func.func @transform_1(%arg0: i32) -> (i32, i32) {
    %c0_i32 = arith.constant 0 : i32
    %c0_i32_0 = arith.constant 0 : i32
    %c0_i32_1 = arith.constant 0 : i32
    return %c0_i32, %c0_i32_0 : i32, i32
  }
  func.func @transform_2(%arg0: i32) -> (i32, i32) {
    %c0_i32 = arith.constant 0 : i32
    %c0_i32_0 = arith.constant 0 : i32
    %c0_i32_1 = arith.constant 0 : i32
    return %c0_i32, %c0_i32_0 : i32, i32
  }
  func.func @transform_3(%arg0: i32) -> (i32, i32, i32) {
    %c0_i32 = arith.constant 0 : i32
    %c0_i32_0 = arith.constant 0 : i32
    %c0_i32_1 = arith.constant 0 : i32
    %c0_i32_2 = arith.constant 0 : i32
    return %c0_i32, %c0_i32_0, %c0_i32_1 : i32, i32, i32
  }
  func.func @transform_4(%arg0: i32) -> (i32, i32, i32) {
    %c0_i32 = arith.constant 0 : i32
    %c0_i32_0 = arith.constant 0 : i32
    %c0_i32_1 = arith.constant 0 : i32
    %c0_i32_2 = arith.constant 0 : i32
    return %c0_i32, %c0_i32_0, %c0_i32_1 : i32, i32, i32
  }
  func.func @transform_5(%arg0: i32) -> (i32, i32) {
    %c0_i32 = arith.constant 0 : i32
    %c0_i32_0 = arith.constant 0 : i32
    %c0_i32_1 = arith.constant 0 : i32
    return %c0_i32, %c0_i32_0 : i32, i32
  }
  func.func @transform_6(%arg0: i32) -> (i32, i32) {
    %c0_i32 = arith.constant 0 : i32
    %c0_i32_0 = arith.constant 0 : i32
    %c0_i32_1 = arith.constant 0 : i32
    return %c0_i32, %c0_i32_0 : i32, i32
  }
  func.func @transform_7(%arg0: i32) -> (i32, i32) {
    %c0_i32 = arith.constant 0 : i32
    %c0_i32_0 = arith.constant 0 : i32
    %c0_i32_1 = arith.constant 0 : i32
    return %c0_i32, %c0_i32_0 : i32, i32
  }
  func.func @transform_8(%arg0: i32) -> (i32, i32) {
    %c0_i32 = arith.constant 0 : i32
    %c0_i32_0 = arith.constant 0 : i32
    %c0_i32_1 = arith.constant 0 : i32
    return %c0_i32, %c0_i32_0 : i32, i32
  }
  func.func @transform_9(%arg0: i32) -> (i32, i32) {
    %c0_i32 = arith.constant 0 : i32
    %c0_i32_0 = arith.constant 0 : i32
    %c0_i32_1 = arith.constant 0 : i32
    return %c0_i32, %c0_i32_0 : i32, i32
  }
  func.func @transform_10(%arg0: i32) -> (i32, i32) {
    %c0_i32 = arith.constant 0 : i32
    %c0_i32_0 = arith.constant 0 : i32
    %c0_i32_1 = arith.constant 0 : i32
    return %c0_i32, %c0_i32_0 : i32, i32
  }
  func.func @transform_11(%arg0: i32) -> (i32, i32, i32) {
    %c0_i32 = arith.constant 0 : i32
    %c0_i32_0 = arith.constant 0 : i32
    %c0_i32_1 = arith.constant 0 : i32
    return %arg0, %c0_i32, %c0_i32_0 : i32, i32, i32
  }
}

</mosaic_0001>

<bundles_post_ra>
// kernel: conv_autoencoder.1
= control target key start
LH: loop header
LB: loop body
LE: loop exit
PB: predicated region body
PF: predicated region fallthrough
CT: control target
= control target key end

     0   :  { %16 = vsyncpa [#allocation3], 0  ;;  %s4100_s0 = inlined_call_operand.vmem [shape: f32[1,8,512], index: 0, kind: input, shape index: {}]   ;;  %s4101_s1 = inlined_call_operand.vmem [shape: f32[16,72], index: 1, kind: input, shape index: {}]   ;;  %s4102_s2 = inlined_call_operand.vmem [shape: f32[4,144], index: 2, kind: input, shape index: {}]   ;;  %s4103_s3 = inlined_call_operand.vmem [shape: f32[4,16,4], index: 3, kind: input, shape index: {}]   ;;  %s4104_s4 = inlined_call_operand.vmem [shape: f32[4,4,16], index: 4, kind: input, shape index: {}]   ;;  %s4105_s5 = inlined_call_operand.hbm [shape: f32[72,512], index: 5, kind: input, shape index: {}]   ;;  %s4106_s6 = inlined_call_operand.vmem [shape: f32[144,128], index: 6, kind: input, shape index: {}]   ;;  %s4107_s7 = inlined_call_operand.vmem [shape: f32[512,128], index: 7, kind: input, shape index: {}]   ;;  %s4108_s8 = inlined_call_operand.hbm [shape: f32[128,32], index: 8, kind: input, shape index: {}]   ;;  %s4109_s9 = inlined_call_operand.hbm [shape: f32[128,128], index: 9, kind: input, shape index: {}]   ;;  %s4110_s10 = inlined_call_operand.hbm [shape: f32[512,512], index: 10, kind: input, shape index: {}]   ;;  %s4111_s11 = inlined_call_operand.vmem [shape: f32[1,4,512], index: 11, kind: output, shape index: {}]  }
   0x1   :  { %17 = vsyncpa [#allocation5], 0 }
   0x2   :  { %18 = vsyncpa [#allocation8], 0  ;;  %s3308_s17 = smov [#allocation4]   ;;  %s3214_s21 = scalar_lea.hbm %s4108_s8, 2048 }
   0x3   :  { %s50_s18 = sshll.u32 %s3308_s17, 4  ;;  %p3215_p0 = scmp.ne.s32.totalorder %s4108_s8, %s3214_s21  ;;  %s51_s18 = int_to_ptr.vmem [resolvable:$true] %s50_s18 }
   0x4   :  { %p3218_p1 = scmp.lt.u32.totalorder %s3214_s21, %s4108_s8 }
   0x6   :  { %p3220_p2 = pnand %p3218_p1, %p3215_p0 }
   0x8   :  { %3223 = shalt.err (!%p3220_p2)
}
   0x9   :  { %s3224_s26 = scalar_lea.vmem %s51_s18, 2048  ;;  %p3229_p4 = scmp.lt.s32.totalorder %s51_s18, %s51_s18 }
   0xa   :  { %p3225_p3 = scmp.ne.s32.totalorder %s51_s18, %s3224_s26  ;;  %p3230_p5 = scmp.lt.s32.totalorder %s3224_s26, %s3224_s26 }
   0xc   :  { %p3231_p6 = por %p3230_p5, %p3229_p4 }
   0xe   :  { %p3232_p7 = pnand %p3231_p6, %p3225_p3 }
  0x10   :  { %3235 = shalt.err (!%p3232_p7)
}
  0x11   :  { %s3309_s27 = smov 128   ;;  %s3310_s28 = smov 8  }
  0x12   :  { %56 = dma.hbm_to_vmem [thread:$0]  %s4108_s8, 2048, %s51_s18, [#allocation5], %s3309_s27, %s3309_s27, %s3310_s28  }
  0x13   :  { %s3311_s12 = smov [#allocation2]   ;;  %s3236_s16 = scalar_lea.hbm %s4105_s5, 4608 }
  0x14   :  { %s34_s13 = sshll.u32 %s3311_s12, 4  ;;  %p3237_p8 = scmp.ne.s32.totalorder %s4105_s5, %s3236_s16  ;;  %s35_s13 = int_to_ptr.vmem [resolvable:$true] %s34_s13 }
  0x15   :  { %p3240_p9 = scmp.lt.u32.totalorder %s3236_s16, %s4105_s5 }
  0x17   :  { %p3242_p10 = pnand %p3240_p9, %p3237_p8 }
  0x19   :  { %3245 = shalt.err (!%p3242_p10)
}
  0x1a   :  { %s3246_s22 = scalar_lea.vmem %s35_s13, 4608  ;;  %p3251_p12 = scmp.lt.s32.totalorder %s35_s13, %s35_s13 }
  0x1b   :  { %p3247_p11 = scmp.ne.s32.totalorder %s35_s13, %s3246_s22  ;;  %p3252_p13 = scmp.lt.s32.totalorder %s3246_s22, %s3246_s22 }
  0x1d   :  { %p3253_p0 = por %p3252_p13, %p3251_p12 }
  0x1f   :  { %p3254_p1 = pnand %p3253_p0, %p3247_p11 }
  0x21   :  { %3257 = shalt.err (!%p3254_p1)
}
  0x22   :  { %s3312_s8 = smov 512   ;;  %s3313_s18 = smov 32  }
  0x23   :  { %40 = dma.hbm_to_vmem [thread:$0]  %s4105_s5, 4608, %s35_s13, [#allocation3], %s3312_s8, %s3312_s8, %s3313_s18  }
  0x24   :  { %s3314_s25 = smov [#allocation6]   ;;  %s3315_s29 = smov [#allocation7]  }
  0x25   :  { %s62_s26 = sshll.u32 %s3314_s25, 4  ;;  %s74_s30 = sshll.u32 %s3315_s29, 4  ;;  %s63_s26 = int_to_ptr.vmem [resolvable:$true] %s62_s26  ;;  %s3424_s30 = int_to_ptr.vmem [resolvable:$true] %s74_s30 }
  0x26   :  { %s3258_s15 = scalar_lea.hbm %s4109_s9, 2048 }
  0x27   :  { %p3259_p2 = scmp.ne.s32.totalorder %s4109_s9, %s3258_s15  ;;  %p3262_p3 = scmp.lt.u32.totalorder %s3258_s15, %s4109_s9 }
  0x29   :  { %p3264_p4 = pnand %p3262_p3, %p3259_p2 }
  0x2b   :  { %3267 = shalt.err (!%p3264_p4)
}
  0x2c   :  { %s3268_s5 = scalar_lea.vmem %s63_s26, 2048  ;;  %p3273_p6 = scmp.lt.s32.totalorder %s63_s26, %s63_s26 }
  0x2d   :  { %p3269_p5 = scmp.ne.s32.totalorder %s63_s26, %s3268_s5  ;;  %p3274_p7 = scmp.lt.s32.totalorder %s3268_s5, %s3268_s5 }
  0x2f   :  { %p3275_p8 = por %p3274_p7, %p3273_p6 }
  0x31   :  { %p3276_p9 = pnand %p3275_p8, %p3269_p5 }
  0x33   :  { %3279 = shalt.err (!%p3276_p9)
}
  0x34   :  { %68 = dma.hbm_to_vmem [thread:$0]  %s4109_s9, 2048, %s63_s26, [#allocation5], %s3309_s27, %s3309_s27, %s3310_s28  }
  0x35   :  { %s3280_s24 = scalar_lea.hbm %s4110_s10, 32768 }
  0x36   :  { %p3281_p10 = scmp.ne.s32.totalorder %s4110_s10, %s3280_s24  ;;  %p3284_p11 = scmp.lt.u32.totalorder %s3280_s24, %s4110_s10 }
  0x38   :  { %p3286_p12 = pnand %p3284_p11, %p3281_p10 }
  0x3a   :  { %3289 = shalt.err (!%p3286_p12)
}
  0x3b   :  { %s3290_s15 = scalar_lea.vmem %s3424_s30, 32768  ;;  %p3295_p0 = scmp.lt.s32.totalorder %s3424_s30, %s3424_s30 }
  0x3c   :  { %p3291_p13 = scmp.ne.s32.totalorder %s3424_s30, %s3290_s15  ;;  %p3296_p1 = scmp.lt.s32.totalorder %s3290_s15, %s3290_s15 }
  0x3e   :  { %p3297_p2 = por %p3296_p1, %p3295_p0 }
  0x40   :  { %p3298_p3 = pnand %p3297_p2, %p3291_p13 }
  0x42   :  { %3301 = shalt.err (!%p3298_p3)
}
  0x43   :  { %80 = dma.hbm_to_vmem [thread:$0]  %s4110_s10, 32768, %s3424_s30, [#allocation8], %s3312_s8, %s3312_s8, %s3313_s18  }
  0x44   :  { %3302 = dma.done.wait [#allocation3], 4608  }
  0x45   :  { %3303 = vsyncadd [#allocation3], 4294962688 }
  0x46   :  { %3304 = dma.done.wait [#allocation5], 4096  }
  0x47   :  { %3305 = vsyncadd [#allocation5], 4294963200 }
  0x48   :  { %3306 = dma.done.wait [#allocation8], 32768  }
  0x49   :  { %3307 = vsyncadd [#allocation8], 4294934528  ;;  %v3464_v0 = vld [vmem:[%s4100_s0 + $0x10] sm:$0xff]  ;;  %v3469_v1 = vld [vmem:[%s4100_s0] sm:$0xff]  ;;  %s3316_s20 = smov 17   ;;  %s3317_s13 = smov 16   ;;  %v143_v5 = vlaneseq }
  0x4a   :  { %139 = vrot.lane.b32.xlu1 %v3464_v0, %s3316_s20  ;;  %135 = vrot.lane.b32.xlu0 %v3469_v1, %s3316_s20  ;;  %v3476_v2 = vld [vmem:[%s4100_s0 + $0x18] sm:$0xff]  ;;  %v3481_v3 = vld [vmem:[%s4100_s0 + $0x8] sm:$0xff]  ;;  %s3318_s21 = smov 15   ;;  %s3319_s0 = smov 1   ;;  %v3323_v4 = vmov 0.0   ;;  %v99_v16 = vld [vmem:[#allocation2] sm:$0xff] }
  0x4b   :  { %s3320_s22 = smov 127   ;;  %s3321_s23 = smov 113   ;;  %348 = vmatprep.mubr.f32.mxu0 %v3323_v4  ;;  %425 = vmatprep.mubr.f32.mxu1 %v3323_v4  ;;  %v3531_v8 = vand.u32 127, %v143_v5  ;;  %v100_v12 = vld [vmem:[#allocation2 + $0x8] sm:$0xff]  ;;  %v101_v19 = vld [vmem:[#allocation2 + $0x10] sm:$0xff]  ;;  %v103_v21 = vld [vmem:[#allocation2 + $0x20] sm:$0xff] }
  0x4c   :  { %s3322_s24 = smov 112   ;;  %s3324_s25 = smov 111   ;;  %v104_v13 = vld [vmem:[#allocation2 + $0x28] sm:$0xff]  ;;  %v105_v25 = vld [vmem:[#allocation2 + $0x30] sm:$0xff]  ;;  %v102_v26 = vld [vmem:[#allocation2 + $0x18] sm:$0xff]  ;;  %vm277_vm8 = vcmask 588800  }
  0x4d   :  { %vm145_vm0 = vcmp.lt.s32.totalorder %v3531_v8, 17  ;;  %vm158_vm1 = vcmp.lt.s32.totalorder %v3531_v8, 16  ;;  %v106_v27 = vld [vmem:[#allocation2 + $0x38] sm:$0xff]  ;;  %vm171_vm2 = vcmp.lt.s32.totalorder %v3531_v8, 15  ;;  %vm184_vm3 = vcmp.lt.s32.totalorder %v3531_v8, 1  ;;  %v108_v47 = vld [vmem:[#allocation2 + $0x48] sm:$0xff] }
  0x4e   :  { %141 = vrot.lane.b32.xlu1 %v3476_v2, %s3316_s20  ;;  %137 = vrot.lane.b32.xlu0 %v3481_v3, %s3316_s20  ;;  %v112_v49 = vld [vmem:[#allocation2 + $0x68] sm:$0xff]  ;;  %v107_v52 = vld [vmem:[#allocation2 + $0x40] sm:$0xff]  ;;  %v109_v56 = vld [vmem:[#allocation2 + $0x50] sm:$0xff]  ;;  %vm197_vm4 = vcmp.lt.s32.totalorder %v3531_v8, 127  ;;  %vm223_vm5 = vcmp.lt.s32.totalorder %v3531_v8, 112  ;;  %vm210_vm6 = vcmp.lt.s32.totalorder %v3531_v8, 113 }
  0x4f   :  { %v110_v57 = vld [vmem:[#allocation2 + $0x58] sm:$0xff]  ;;  %v111_v61 = vld [vmem:[#allocation2 + $0x60] sm:$0xff]  ;;  %v113_v62 = vld [vmem:[#allocation2 + $0x70] sm:$0xff]  ;;  %vm236_vm7 = vcmp.lt.s32.totalorder %v3531_v8, 111  ;;  %s3328_s14 = smov 121   ;;  %s3329_s15 = smov 120  }
  0x50   :  { %v114_v63 = vld [vmem:[#allocation2 + $0x78] sm:$0xff]  ;;  %s3330_s9 = smov 119   ;;  %vm827_vm9 = vcmask 130048   ;;  %vm3331_vm10 = vmmov 0   ;;  %vm1014_vm11 = vcmask 31744   ;;  %vm1021_vm12 = vcmask 1043456  }
  0x51   :  { %s3333_s27 = smov 96   ;;  %vm1376_vm13 = vcmask 261120   ;;  %vm1379_vm14 = vcmask 523264   ;;  %vm1382_vm15 = vcmask 785408  }
  0x52   :  { %152 = vrot.lane.b32.xlu1 %v3481_v3, %s3317_s13  ;;  %150 = vrot.lane.b32.xlu0 %v3469_v1, %s3317_s13 }
  0x56   :  { %156 = vrot.lane.b32.xlu1 %v3476_v2, %s3317_s13  ;;  %154 = vrot.lane.b32.xlu0 %v3464_v0, %s3317_s13 }
  0x5a   :  { %165 = vrot.lane.b32.xlu1 %v3481_v3, %s3318_s21  ;;  %163 = vrot.lane.b32.xlu0 %v3469_v1, %s3318_s21 }
  0x5e   :  { %169 = vrot.lane.b32.xlu1 %v3476_v2, %s3318_s21  ;;  %167 = vrot.lane.b32.xlu0 %v3464_v0, %s3318_s21 }
  0x62   :  { %178 = vrot.lane.b32.xlu1 %v3481_v3, %s3319_s0  ;;  %176 = vrot.lane.b32.xlu0 %v3469_v1, %s3319_s0 }
  0x66   :  { %182 = vrot.lane.b32.xlu1 %v3476_v2, %s3319_s0  ;;  %180 = vrot.lane.b32.xlu0 %v3464_v0, %s3319_s0 }
  0x6a   :  { %191 = vrot.lane.b32.xlu1 %v3481_v3, %s3320_s22  ;;  %189 = vrot.lane.b32.xlu0 %v3469_v1, %s3320_s22 }
  0x6e   :  { %195 = vrot.lane.b32.xlu1 %v3476_v2, %s3320_s22  ;;  %193 = vrot.lane.b32.xlu0 %v3464_v0, %s3320_s22 }
  0x72   :  { %204 = vrot.lane.b32.xlu1 %v3481_v3, %s3321_s23  ;;  %202 = vrot.lane.b32.xlu0 %v3469_v1, %s3321_s23 }
  0x76   :  { %208 = vrot.lane.b32.xlu1 %v3476_v2, %s3321_s23  ;;  %206 = vrot.lane.b32.xlu0 %v3464_v0, %s3321_s23 }
  0x7a   :  { %217 = vrot.lane.b32.xlu1 %v3481_v3, %s3322_s24  ;;  %215 = vrot.lane.b32.xlu0 %v3469_v1, %s3322_s24 }
  0x7e   :  { %221 = vrot.lane.b32.xlu1 %v3476_v2, %s3322_s24  ;;  %219 = vrot.lane.b32.xlu0 %v3464_v0, %s3322_s24 }
  0x82   :  { %230 = vrot.lane.b32.xlu1 %v3481_v3, %s3324_s25  ;;  %228 = vrot.lane.b32.xlu0 %v3469_v1, %s3324_s25 }
  0x86   :  { %234 = vrot.lane.b32.xlu1 %v3476_v2, %s3324_s25  ;;  %232 = vrot.lane.b32.xlu0 %v3464_v0, %s3324_s25 }
  0xbc   :  { %v140_v6 = vpop.permute.xlu1 %139  ;;  %v136_v7 = vpop.permute.xlu0 %135 }
  0xc0   :  { %v142_v9 = vpop.permute.xlu1 %141  ;;  %v138_v10 = vpop.permute.xlu0 %137 }
  0xc1   :  { %v148_v11 = vsel %vm145_vm0, %v136_v7, %v138_v10  ;;  %v149_v17 = vsel %vm145_vm0, %v142_v9, %v136_v7  ;;  %v147_v20 = vsel %vm145_vm0, %v138_v10, %v140_v6  ;;  %v146_v24 = vsel %vm145_vm0, %v140_v6, %v142_v9 }
  0xc2   :  { %v242_v22 = vmul.f32 %v148_v11, %v100_v12  ;;  %v241_v28 = vmul.f32 %v149_v17, %v99_v16  ;;  %v243_v32 = vmul.f32 %v147_v20, %v101_v19  ;;  %v244_v38 = vmul.f32 %v146_v24, %v102_v26  ;;  %v116_v24 = vld [vmem:[#allocation2 + $0x88] sm:$0xff]  ;;  %v117_v26 = vld [vmem:[#allocation2 + $0x90] sm:$0xff] }
  0xc4   :  { %v153_v14 = vpop.permute.xlu1 %152  ;;  %v151_v15 = vpop.permute.xlu0 %150 }
  0xc5   :  { %v161_v18 = vsel %vm158_vm1, %v151_v15, %v153_v14 }
  0xc6   :  { %v246_v23 = vmul.f32 %v161_v18, %v104_v13 }
  0xc8   :  { %v157_v29 = vpop.permute.xlu1 %156  ;;  %v155_v30 = vpop.permute.xlu0 %154  ;;  %v2645_v31 = vpack.c.bf16 %v246_v23, %v242_v22  ;;  %v115_v23 = vld [vmem:[#allocation2 + $0x80] sm:$0xff] }
  0xc9   :  { %v162_v33 = vsel %vm158_vm1, %v157_v29, %v151_v15  ;;  %v159_v34 = vsel %vm158_vm1, %v155_v30, %v157_v29  ;;  %v160_v35 = vsel %vm158_vm1, %v153_v14, %v155_v30  ;;  %v122_v29 = vld [vmem:[#allocation2 + $0xb8] sm:$0xff]  ;;  %v120_v30 = vld [vmem:[#allocation2 + $0xa8] sm:$0xff] }
  0xca   :  { %v245_v36 = vmul.f32 %v162_v33, %v103_v21  ;;  %v247_v37 = vmul.f32 %v160_v35, %v105_v25  ;;  %2646 = vmatprep.subr.bf16.mxu0 %v2645_v31  ;;  %v248_v39 = vmul.f32 %v159_v34, %v106_v27  ;;  %v118_v25 = vld [vmem:[#allocation2 + $0x98] sm:$0xff]  ;;  %v119_v27 = vld [vmem:[#allocation2 + $0xa0] sm:$0xff]  ;;  %v121_v31 = vld [vmem:[#allocation2 + $0xb0] sm:$0xff]  ;;  %v258_v34 = vmul.f32 %v116_v24, %v3481_v3 }
  0xcb   :  { %v260_v35 = vmul.f32 %v118_v25, %v3476_v2  ;;  %v134_v25 = vld [vmem:[#allocation2 + $0x118] sm:$0xff] }
  0xcc   :  { %v166_v40 = vpop.permute.xlu1 %165  ;;  %v164_v41 = vpop.permute.xlu0 %163  ;;  %v2647_v42 = vpack.c.bf16 %v245_v36, %v241_v28  ;;  %v2661_v43 = vpack.c.bf16 %v248_v39, %v244_v38  ;;  %v2663_v44 = vpack.c.bf16 %v247_v37, %v243_v32  ;;  %v257_v36 = vmul.f32 %v115_v23, %v3469_v1 }
  0xcd   :  { %v174_v48 = vsel %vm171_vm2, %v164_v41, %v166_v40  ;;  %v259_v37 = vmul.f32 %v117_v26, %v3464_v0  ;;  %v132_v26 = vld [vmem:[#allocation2 + $0x108] sm:$0xff] }
  0xce   :  { %2648 = vmatpush1.bf16.msra.mxu0 %v2647_v42  ;;  %2662 = vmatprep.subr.bf16.mxu1 %v2661_v43  ;;  %v250_v55 = vmul.f32 %v174_v48, %v108_v47 }
  0xcf   :  { %2664 = vmatpush1.bf16.msra.mxu1 %v2663_v44 }
  0xd0   :  { %v170_v45 = vpop.permute.xlu1 %169  ;;  %v168_v46 = vpop.permute.xlu0 %167 }
  0xd1   :  { %v175_v53 = vsel %vm171_vm2, %v170_v45, %v164_v41  ;;  %v173_v58 = vsel %vm171_vm2, %v166_v40, %v168_v46  ;;  %v172_v60 = vsel %vm171_vm2, %v168_v46, %v170_v45 }
  0xd2   :  { %v249_v5 = vmul.f32 %v175_v53, %v107_v52  ;;  %v251_v10 = vmul.f32 %v173_v58, %v109_v56  ;;  %v252_v14 = vmul.f32 %v172_v60, %v110_v57  ;;  %v124_v53 = vld [vmem:[#allocation2 + $0xc8] sm:$0xff]  ;;  %v127_v56 = vld [vmem:[#allocation2 + $0xe0] sm:$0xff] }
  0xd3   :  { %v128_v60 = vld [vmem:[#allocation2 + $0xe8] sm:$0xff] }
  0xd4   :  { %v179_v50 = vpop.permute.xlu1 %178  ;;  %v177_v51 = vpop.permute.xlu0 %176 }
  0xd5   :  { %v187_v54 = vsel %vm184_vm3, %v177_v51, %v179_v50 }
  0xd6   :  { %v254_v59 = vmul.f32 %v187_v54, %v112_v49 }
  0xd8   :  { %v183_v6 = vpop.permute.xlu1 %182  ;;  %v181_v7 = vpop.permute.xlu0 %180  ;;  %v2649_v9 = vpack.c.bf16 %v254_v59, %v250_v55  ;;  %v125_v55 = vld [vmem:[#allocation2 + $0xd0] sm:$0xff]  ;;  %v130_v59 = vld [vmem:[#allocation2 + $0xf8] sm:$0xff] }
  0xd9   :  { %v188_v11 = vsel %vm184_vm3, %v183_v6, %v177_v51  ;;  %v185_v12 = vsel %vm184_vm3, %v181_v7, %v183_v6  ;;  %v186_v13 = vsel %vm184_vm3, %v179_v50, %v181_v7  ;;  %v126_v51 = vld [vmem:[#allocation2 + $0xd8] sm:$0xff] }
  0xda   :  { %v253_v15 = vmul.f32 %v188_v11, %v111_v61  ;;  %v255_v16 = vmul.f32 %v186_v13, %v113_v62  ;;  %v256_v17 = vmul.f32 %v185_v12, %v114_v63  ;;  %2650 = vmatprep.subr.bf16.mxu0 %v2649_v9  ;;  %v129_v61 = vld [vmem:[#allocation2 + $0xf0] sm:$0xff]  ;;  %v123_v62 = vld [vmem:[#allocation2 + $0xc0] sm:$0xff] }
  0xdc   :  { %v192_v18 = vpop.permute.xlu1 %191  ;;  %v190_v19 = vpop.permute.xlu0 %189  ;;  %v2651_v20 = vpack.c.bf16 %v253_v15, %v249_v5  ;;  %v2665_v21 = vpack.c.bf16 %v256_v17, %v252_v14  ;;  %v2667_v22 = vpack.c.bf16 %v255_v16, %v251_v10 }
  0xdd   :  { %v200_v28 = vsel %vm197_vm4, %v190_v19, %v192_v18 }
  0xde   :  { %2652 = vmatpush1.bf16.msra.mxu0 %v2651_v20  ;;  %2666 = vmatprep.subr.bf16.mxu1 %v2665_v21  ;;  %v261_v38 = vmul.f32 %v200_v28, %v119_v27  ;;  %v133_v27 = vld [vmem:[#allocation2 + $0x110] sm:$0xff]  ;;  %v131_v28 = vld [vmem:[#allocation2 + $0x100] sm:$0xff] }
  0xdf   :  { %2668 = vmatpush1.bf16.msra.mxu1 %v2667_v22 }
  0xe0   :  { %v196_v32 = vpop.permute.xlu1 %195  ;;  %v194_v33 = vpop.permute.xlu0 %193  ;;  %v2655_v47 = vpack.c.bf16 %v261_v38, %v257_v36 }
  0xe1   :  { %v201_v39 = vsel %vm197_vm4, %v196_v32, %v190_v19  ;;  %v198_v40 = vsel %vm197_vm4, %v194_v33, %v196_v32  ;;  %v199_v41 = vsel %vm197_vm4, %v192_v18, %v194_v33 }
  0xe2   :  { %v264_v42 = vmul.f32 %v201_v39, %v122_v29  ;;  %v262_v43 = vmul.f32 %v199_v41, %v120_v30  ;;  %v263_v44 = vmul.f32 %v198_v40, %v121_v31  ;;  %v97_v39 = vld [vmem:[%s4101_s1] sm:$0xff]  ;;  %v98_v40 = vld [vmem:[%s4101_s1 + $0x8] sm:$0xff] }
  0xe3   :  { %v462_v41 = vld [vmem:[%s4107_s7 + $0x80] sm:$0xff] }
  0xe4   :  { %v205_v3 = vpop.permute.xlu1 %204  ;;  %v203_v45 = vpop.permute.xlu0 %202  ;;  %v2653_v2 = vpack.c.bf16 %v262_v43, %v258_v34  ;;  %v2669_v46 = vpack.c.bf16 %v264_v42, %v260_v35  ;;  %v2671_v1 = vpack.c.bf16 %v263_v44, %v259_v37  ;;  %v463_v42 = vld [vmem:[%s4107_s7 + $0x88] sm:$0xff]  ;;  %v494_v43 = vld [vmem:[%s4107_s7 + $0x180] sm:$0xff] }
  0xe5   :  { %v213_v63 = vsel %vm210_vm6, %v203_v45, %v205_v3  ;;  %v2677_v44 = vpack.c.bf16 %v463_v42, %v462_v41  ;;  %v504_v41 = vld [vmem:[%s4107_s7 + $0x1d0] sm:$0xff] }
  0xe6   :  { %2654 = vmatprep.subr.bf16.mxu0 %v2653_v2  ;;  %2670 = vmatprep.subr.bf16.mxu1 %v2669_v46  ;;  %v265_v18 = vmul.f32 %v213_v63, %v123_v62  ;;  %v447_v2 = vld [vmem:[%s4107_s7 + $0x8] sm:$0xff] }
  0xe7   :  { %2656 = vmatpush1.bf16.msra.mxu0 %v2655_v47  ;;  %2672 = vmatpush1.bf16.msra.mxu1 %v2671_v1  ;;  %v478_v47 = vld [vmem:[%s4107_s7 + $0x100] sm:$0xff] }
  0xe8   :  { %v209_v0 = vpop.permute.xlu1 %208  ;;  %v207_v48 = vpop.permute.xlu0 %206 }
  0xe9   :  { %v214_v52 = vsel %vm210_vm6, %v209_v0, %v203_v45  ;;  %v212_v54 = vsel %vm210_vm6, %v205_v3, %v207_v48  ;;  %v211_v58 = vsel %vm210_vm6, %v207_v48, %v209_v0  ;;  %v495_v3 = vld [vmem:[%s4107_s7 + $0x188] sm:$0xff]  ;;  %v446_v45 = vld [vmem:[%s4107_s7] sm:$0xff]  ;;  %v464_v48 = vld [vmem:[%s4107_s7 + $0x90] sm:$0xff] }
  0xea   :  { %v268_v5 = vmul.f32 %v214_v52, %v126_v51  ;;  %v266_v6 = vmul.f32 %v212_v54, %v124_v53  ;;  %v267_v14 = vmul.f32 %v211_v58, %v125_v55  ;;  %v2709_v46 = vpack.c.bf16 %v495_v3, %v494_v43  ;;  %v479_v0 = vld [vmem:[%s4107_s7 + $0x108] sm:$0xff]  ;;  %v496_v51 = vld [vmem:[%s4107_s7 + $0x190] sm:$0xff]  ;;  %v497_v52 = vld [vmem:[%s4107_s7 + $0x198] sm:$0xff] }
  0xeb   :  { %v2679_v1 = vpack.c.bf16 %v447_v2, %v446_v45  ;;  %v2713_v54 = vpack.c.bf16 %v497_v52, %v496_v51  ;;  %v448_v55 = vld [vmem:[%s4107_s7 + $0x10] sm:$0xff]  ;;  %v505_v43 = vld [vmem:[%s4107_s7 + $0x1d8] sm:$0xff]  ;;  %v507_v51 = vld [vmem:[%s4107_s7 + $0x1e8] sm:$0xff] }
  0xec   :  { %v218_v49 = vpop.permute.xlu1 %217  ;;  %v216_v50 = vpop.permute.xlu0 %215  ;;  %v489_v3 = vld [vmem:[%s4107_s7 + $0x158] sm:$0xff]  ;;  %v2729_v45 = vpack.c.bf16 %v505_v43, %v504_v41  ;;  %v490_v52 = vld [vmem:[%s4107_s7 + $0x160] sm:$0xff] }
  0xed   :  { %v226_v57 = vsel %vm223_vm5, %v216_v50, %v218_v49 }
  0xee   :  { %v269_v10 = vmul.f32 %v226_v57, %v127_v56  ;;  %v449_v56 = vld [vmem:[%s4107_s7 + $0x18] sm:$0xff]  ;;  %v480_v57 = vld [vmem:[%s4107_s7 + $0x110] sm:$0xff] }
  0xef   :  { %v2683_v58 = vpack.c.bf16 %v449_v56, %v448_v55  ;;  %v458_v56 = vld [vmem:[%s4107_s7 + $0x60] sm:$0xff] }
  0xf0   :  { %v222_v7 = vpop.permute.xlu1 %221  ;;  %v220_v9 = vpop.permute.xlu0 %219  ;;  %v2659_v24 = vpack.c.bf16 %v269_v10, %v265_v18  ;;  %v451_v10 = vld [vmem:[%s4107_s7 + $0x28] sm:$0xff] }
  0xf1   :  { %v227_v11 = vsel %vm223_vm5, %v222_v7, %v216_v50  ;;  %v224_v12 = vsel %vm223_vm5, %v220_v9, %v222_v7  ;;  %v225_v13 = vsel %vm223_vm5, %v218_v49, %v220_v9  ;;  %v2711_v49 = vpack.c.bf16 %v479_v0, %v478_v47  ;;  %v465_v50 = vld [vmem:[%s4107_s7 + $0x98] sm:$0xff]  ;;  %v450_v7 = vld [vmem:[%s4107_s7 + $0x20] sm:$0xff] }
  0xf2   :  { %v272_v15 = vmul.f32 %v227_v11, %v130_v59  ;;  %v270_v16 = vmul.f32 %v225_v13, %v128_v60  ;;  %v271_v17 = vmul.f32 %v224_v12, %v129_v61  ;;  %v2681_v53 = vpack.c.bf16 %v465_v50, %v464_v48  ;;  %v481_v59 = vld [vmem:[%s4107_s7 + $0x118] sm:$0xff]  ;;  %v466_v60 = vld [vmem:[%s4107_s7 + $0xa0] sm:$0xff]  ;;  %v467_v61 = vld [vmem:[%s4107_s7 + $0xa8] sm:$0xff] }
  0xf3   :  { %v2715_v62 = vpack.c.bf16 %v481_v59, %v480_v57  ;;  %v2685_v63 = vpack.c.bf16 %v467_v61, %v466_v60  ;;  %v482_v11 = vld [vmem:[%s4107_s7 + $0x120] sm:$0xff]  ;;  %v483_v12 = vld [vmem:[%s4107_s7 + $0x128] sm:$0xff]  ;;  %v2687_v13 = vpack.c.bf16 %v451_v10, %v450_v7  ;;  %v477_v7 = vld [vmem:[%s4107_s7 + $0xf8] sm:$0xff] }
  0xf4   :  { %v231_v19 = vpop.permute.xlu1 %230  ;;  %v229_v20 = vpop.permute.xlu0 %228  ;;  %v2657_v21 = vpack.c.bf16 %v270_v16, %v266_v6  ;;  %v2673_v22 = vpack.c.bf16 %v272_v15, %v268_v5  ;;  %v2675_v23 = vpack.c.bf16 %v271_v17, %v267_v14  ;;  %v498_v5 = vld [vmem:[%s4107_s7 + $0x1a0] sm:$0xff]  ;;  %v499_v6 = vld [vmem:[%s4107_s7 + $0x1a8] sm:$0xff]  ;;  %v468_v14 = vld [vmem:[%s4107_s7 + $0xb0] sm:$0xff]  ;;  %v2719_v17 = vpack.c.bf16 %v483_v12, %v482_v11 }
  0xf5   :  { %v239_v29 = vsel %vm236_vm7, %v229_v20, %v231_v19  ;;  %v2717_v9 = vpack.c.bf16 %v499_v6, %v498_v5  ;;  %v469_v15 = vld [vmem:[%s4107_s7 + $0xb8] sm:$0xff]  ;;  %v500_v16 = vld [vmem:[%s4107_s7 + $0x1b0] sm:$0xff]  ;;  %v474_v0 = vld [vmem:[%s4107_s7 + $0xe0] sm:$0xff] }
  0xf6   :  { %2658 = vmatprep.subr.bf16.mxu0 %v2657_v21  ;;  %2674 = vmatprep.subr.bf16.mxu1 %v2673_v22  ;;  %v273_v38 = vmul.f32 %v239_v29, %v131_v28  ;;  %v2689_v18 = vpack.c.bf16 %v469_v15, %v468_v14  ;;  %v453_v21 = vld [vmem:[%s4107_s7 + $0x38] sm:$0xff]  ;;  %v503_v28 = vld [vmem:[%s4107_s7 + $0x1c8] sm:$0xff]  ;;  %v476_v6 = vld [vmem:[%s4107_s7 + $0xf0] sm:$0xff] }
  0xf7   :  { %2660 = vmatpush1.bf16.msra.mxu0 %v2659_v24  ;;  %2676 = vmatpush1.bf16.msra.mxu1 %v2675_v23  ;;  %v484_v23 = vld [vmem:[%s4107_s7 + $0x130] sm:$0xff]  ;;  %v485_v24 = vld [vmem:[%s4107_s7 + $0x138] sm:$0xff]  ;;  %v475_v48 = vld [vmem:[%s4107_s7 + $0xe8] sm:$0xff]  ;;  %v2705_v11 = vpack.c.bf16 %v477_v7, %v476_v6 }
  0xf8   :  { %v235_v30 = vpop.permute.xlu1 %234  ;;  %v233_v31 = vpop.permute.xlu0 %232  ;;  %v2701_v50 = vpack.c.bf16 %v475_v48, %v474_v0  ;;  %v459_v57 = vld [vmem:[%s4107_s7 + $0x68] sm:$0xff]  ;;  %v508_v12 = vld [vmem:[%s4107_s7 + $0x1f0] sm:$0xff] }
  0xf9   :  { %v240_v32 = vsel %vm236_vm7, %v235_v30, %v229_v20  ;;  %v237_v33 = vsel %vm236_vm7, %v233_v31, %v235_v30  ;;  %v238_v34 = vsel %vm236_vm7, %v231_v19, %v233_v31  ;;  %v501_v19 = vld [vmem:[%s4107_s7 + $0x1b8] sm:$0xff]  ;;  %v452_v20 = vld [vmem:[%s4107_s7 + $0x30] sm:$0xff]  ;;  %v2723_v30 = vpack.c.bf16 %v485_v24, %v484_v23 }
  0xfa   :  { %v276_v35 = vmul.f32 %v240_v32, %v134_v25  ;;  %v274_v36 = vmul.f32 %v238_v34, %v132_v26  ;;  %v275_v37 = vmul.f32 %v237_v33, %v133_v27  ;;  %v2721_v22 = vpack.c.bf16 %v501_v19, %v500_v16  ;;  %v470_v25 = vld [vmem:[%s4107_s7 + $0xc0] sm:$0xff]  ;;  %v471_v26 = vld [vmem:[%s4107_s7 + $0xc8] sm:$0xff]  ;;  %v492_v14 = vld [vmem:[%s4107_s7 + $0x170] sm:$0xff] }
  0xfb   :  { %v502_v27 = vld [vmem:[%s4107_s7 + $0x1c0] sm:$0xff]  ;;  %v2691_v29 = vpack.c.bf16 %v453_v21, %v452_v20  ;;  %v2693_v31 = vpack.c.bf16 %v471_v26, %v470_v25  ;;  %v487_v34 = vld [vmem:[%s4107_s7 + $0x148] sm:$0xff]  ;;  %v2703_v60 = vpack.c.bf16 %v459_v57, %v458_v56  ;;  %v493_v16 = vld [vmem:[%s4107_s7 + $0x178] sm:$0xff] }
  0xfc   :  { %300 = vmatprep.subr.mxu0 %v274_v36  ;;  %377 = vmatprep.subr.mxu1 %v276_v35  ;;  %v2725_v32 = vpack.c.bf16 %v503_v28, %v502_v27  ;;  %v486_v33 = vld [vmem:[%s4107_s7 + $0x140] sm:$0xff]  ;;  %v2739_v25 = vpack.c.bf16 %v493_v16, %v492_v14 }
  0xfd   :  { %301 = vmatpush1.msra.mxu0 %v273_v38  ;;  %378 = vmatpush1.msra.mxu1 %v275_v37  ;;  %v2727_v35 = vpack.c.bf16 %v487_v34, %v486_v33  ;;  %v454_v36 = vld [vmem:[%s4107_s7 + $0x40] sm:$0xff]  ;;  %v455_v37 = vld [vmem:[%s4107_s7 + $0x48] sm:$0xff] }
  0xfe   :  { %2362 = vmatmul.mubr.msk.f32.vlgmr.msra.gmra.mrb[0].mxu0 %vm277_vm8, %v97_v39  ;;  %2364 = vmatmul.mubr.msk.f32.vlgmr.msra.gmra.mrb[0].mxu1 %vm277_vm8, %v97_v39  ;;  %v2695_v38 = vpack.c.bf16 %v455_v37, %v454_v36  ;;  %v472_v39 = vld [vmem:[%s4107_s7 + $0xd0] sm:$0xff] }
  0xff   :  { %354 = vmatprep.mubr.f32.mxu0 %v3323_v4  ;;  %431 = vmatprep.mubr.f32.mxu1 %v3323_v4 }
 0x100   :  { %2678 = vmatprep.subr.bf16.mxu0 %v2677_v44  ;;  %2710 = vmatprep.subr.bf16.mxu1 %v2709_v46  ;;  %v488_v44 = vld [vmem:[%s4107_s7 + $0x150] sm:$0xff] }
 0x101   :  { %2680 = vmatpush3.bf16.msra.mxu0 %v2679_v1  ;;  %2712 = vmatpush3.bf16.msra.mxu1 %v2711_v49  ;;  %v2731_v2 = vpack.c.bf16 %v489_v3, %v488_v44  ;;  %v456_v46 = vld [vmem:[%s4107_s7 + $0x50] sm:$0xff]  ;;  %v457_v1 = vld [vmem:[%s4107_s7 + $0x58] sm:$0xff]  ;;  %v506_v49 = vld [vmem:[%s4107_s7 + $0x1e0] sm:$0xff] }
 0x102   :  { %2363 = vmatmul.mubr.msk.f32.gmra.mrb[2].mxu0 %vm277_vm8, %v98_v40  ;;  %2365 = vmatmul.mubr.msk.f32.gmra.mrb[2].mxu1 %vm277_vm8, %v98_v40  ;;  %v473_v40 = vld [vmem:[%s4107_s7 + $0xd8] sm:$0xff]  ;;  %v2699_v47 = vpack.c.bf16 %v457_v1, %v456_v46 }
 0x103   :  { %2682 = vmatprep.subr.bf16.mxu0 %v2681_v53  ;;  %2714 = vmatprep.subr.bf16.mxu1 %v2713_v54  ;;  %v2697_v42 = vpack.c.bf16 %v473_v40, %v472_v39  ;;  %v491_v53 = vld [vmem:[%s4107_s7 + $0x168] sm:$0xff]  ;;  %v2733_v54 = vpack.c.bf16 %v507_v51, %v506_v49 }
 0x104   :  { %v2735_v55 = vpack.c.bf16 %v491_v53, %v490_v52 }
 0x105   :  { %2684 = vmatpush3.bf16.msra.mxu0 %v2683_v58  ;;  %2716 = vmatpush3.bf16.msra.mxu1 %v2715_v62 }
 0x106   :  { %2686 = vmatprep.subr.bf16.mxu0 %v2685_v63  ;;  %2718 = vmatprep.subr.bf16.mxu1 %v2717_v9 }
 0x109   :  { %2688 = vmatpush3.bf16.msra.mxu0 %v2687_v13  ;;  %2720 = vmatpush3.bf16.msra.mxu1 %v2719_v17  ;;  %v509_v13 = vld [vmem:[%s4107_s7 + $0x1f8] sm:$0xff]  ;;  %v460_v17 = vld [vmem:[%s4107_s7 + $0x70] sm:$0xff] }
 0x10a   :  { %2690 = vmatprep.subr.bf16.mxu0 %v2689_v18  ;;  %2722 = vmatprep.subr.bf16.mxu1 %v2721_v22  ;;  %v2737_v15 = vpack.c.bf16 %v509_v13, %v508_v12  ;;  %v461_v18 = vld [vmem:[%s4107_s7 + $0x78] sm:$0xff]  ;;  %s3325_s7 = smov 9  }
 0x10b   :  { %v2707_v26 = vpack.c.bf16 %v461_v18, %v460_v17 }
 0x10d   :  { %2692 = vmatpush3.bf16.msra.mxu0 %v2691_v29  ;;  %2724 = vmatpush3.bf16.msra.mxu1 %v2723_v30 }
 0x10e   :  { %2694 = vmatprep.subr.bf16.mxu0 %v2693_v31  ;;  %2726 = vmatprep.subr.bf16.mxu1 %v2725_v32 }
 0x111   :  { %2728 = vmatpush3.bf16.msra.mxu1 %v2727_v35  ;;  %2696 = vmatpush3.bf16.msra.mxu0 %v2695_v38 }
 0x112   :  { %2698 = vmatprep.subr.bf16.mxu0 %v2697_v42  ;;  %2730 = vmatprep.subr.bf16.mxu1 %v2729_v45 }
 0x115   :  { %2732 = vmatpush3.bf16.msra.mxu1 %v2731_v2  ;;  %2700 = vmatpush3.bf16.msra.mxu0 %v2699_v47 }
 0x116   :  { %2702 = vmatprep.subr.bf16.mxu0 %v2701_v50  ;;  %2734 = vmatprep.subr.bf16.mxu1 %v2733_v54 }
 0x119   :  { %2736 = vmatpush3.bf16.msra.mxu1 %v2735_v55  ;;  %2704 = vmatpush3.bf16.msra.mxu0 %v2703_v60 }
 0x11a   :  { %2706 = vmatprep.subr.bf16.mxu0 %v2705_v11  ;;  %2738 = vmatprep.subr.bf16.mxu1 %v2737_v15 }
 0x11d   :  { %2740 = vmatpush3.bf16.msra.mxu1 %v2739_v25  ;;  %2708 = vmatpush3.bf16.msra.mxu0 %v2707_v26 }
 0x1d1   :  { %v3777_v58 = vpop.f32.mrb[0].mxu0  ;;  %v3779_v59 = vpop.f32.mrb[0].mxu1 }
 0x1d2   :  { %v438_v61 = vmax.f32 %v3777_v58, 0.0  ;;  %v440_v62 = vmax.f32 %v3779_v59, 0.0  ;;  %v3783_v63 = vpop.f32.mrb[1].mxu0  ;;  %v3785_v5 = vpop.f32.mrb[1].mxu1 }
 0x1d3   :  { %v439_v9 = vmax.f32 %v3783_v63, 0.0  ;;  %v441_v10 = vmax.f32 %v3785_v5, 0.0 }
 0x1d5   :  { %v3127_v19 = vpack.i.bf16 %v441_v10, %v440_v62  ;;  %v3122_v20 = vpack.i.bf16 %v439_v9, %v438_v61  ;;  %v3821_v21 = vpop.f32.mrb[2].mxu0  ;;  %v3823_v22 = vpop.f32.mrb[2].mxu1 }
 0x1d6   :  { %v3825_v23 = vpop.f32.mrb[3].mxu0  ;;  %v3827_v24 = vpop.f32.mrb[3].mxu1  ;;  %v442_v27 = vmax.f32 %v3821_v21, 0.0  ;;  %v444_v28 = vmax.f32 %v3823_v22, 0.0 }
 0x1d7   :  { %3128 = vrot.lane.b32.xlu1 %v3127_v19, %s3320_s22  ;;  %3123 = vrot.lane.b32.xlu0 %v3122_v20, %s3320_s22  ;;  %v443_v29 = vmax.f32 %v3825_v23, 0.0  ;;  %v445_v30 = vmax.f32 %v3827_v24, 0.0 }
 0x1d9   :  { %v3157_v31 = vpack.i.bf16 %v445_v30, %v444_v28  ;;  %v3152_v32 = vpack.i.bf16 %v443_v29, %v442_v27 }
 0x1db   :  { %3138 = vrot.lane.b32.xlu1 %v3127_v19, %s3322_s24  ;;  %3133 = vrot.lane.b32.xlu0 %v3122_v20, %s3322_s24 }
 0x1df   :  { %3148 = vrot.lane.b32.xlu1 %v3127_v19, %s3324_s25  ;;  %3143 = vrot.lane.b32.xlu0 %v3122_v20, %s3324_s25 }
 0x1e3   :  { %3158 = vrot.lane.b32.xlu1 %v3157_v31, %s3320_s22  ;;  %3153 = vrot.lane.b32.xlu0 %v3152_v32, %s3320_s22 }
 0x1e7   :  { %3168 = vrot.lane.b32.xlu1 %v3157_v31, %s3322_s24  ;;  %3163 = vrot.lane.b32.xlu0 %v3152_v32, %s3322_s24  ;;  %s3327_s24 = smov 7  }
 0x1eb   :  { %3178 = vrot.lane.b32.xlu1 %v3157_v31, %s3324_s25  ;;  %3173 = vrot.lane.b32.xlu0 %v3152_v32, %s3324_s25 }
 0x249   :  { %v3129_v33 = vpop.permute.xlu1 %3128  ;;  %v3124_v34 = vpop.permute.xlu0 %3123 }
 0x24a   :  { %v3131_v35 = vunpack.i.h.bf16 %v3129_v33  ;;  %v3130_v36 = vunpack.i.l.bf16 %v3129_v33  ;;  %v3126_v37 = vunpack.i.h.bf16 %v3124_v34  ;;  %v3125_v38 = vunpack.i.l.bf16 %v3124_v34 }
 0x24c   :  { %v526_v39 = vsel %vm197_vm4, %v3130_v36, %v3131_v35  ;;  %v528_v40 = vsel %vm197_vm4, %v3126_v37, %v3130_v36  ;;  %v530_v41 = vsel %vm197_vm4, %v3125_v38, %v3126_v37  ;;  %v532_v42 = vsel %vm197_vm4, %v3131_v35, %v3125_v38 }
 0x24d   :  { %v3139_v43 = vpop.permute.xlu1 %3138  ;;  %v3134_v44 = vpop.permute.xlu0 %3133  ;;  %v536_v49 = vmax.f32 %v440_v62, %v526_v39  ;;  %v535_v50 = vmax.f32 %v439_v9, %v528_v40  ;;  %v534_v51 = vmax.f32 %v438_v61, %v530_v41  ;;  %v537_v52 = vmax.f32 %v441_v10, %v532_v42 }
 0x24e   :  { %v3141_v3 = vunpack.i.h.bf16 %v3139_v43  ;;  %v3140_v45 = vunpack.i.l.bf16 %v3139_v43  ;;  %v3136_v2 = vunpack.i.h.bf16 %v3134_v44  ;;  %v3135_v46 = vunpack.i.l.bf16 %v3134_v44 }
 0x250   :  { %v558_v1 = vsel %vm223_vm5, %v3140_v45, %v3141_v3  ;;  %v560_v47 = vsel %vm223_vm5, %v3136_v2, %v3140_v45  ;;  %v562_v0 = vsel %vm223_vm5, %v3135_v46, %v3136_v2  ;;  %v564_v48 = vsel %vm223_vm5, %v3141_v3, %v3135_v46 }
 0x251   :  { %v3149_v53 = vpop.permute.xlu1 %3148  ;;  %v3144_v54 = vpop.permute.xlu0 %3143  ;;  %v568_v6 = vmax.f32 %v536_v49, %v558_v1  ;;  %v566_v7 = vmax.f32 %v534_v51, %v562_v0  ;;  %v567_v11 = vmax.f32 %v535_v50, %v560_v47  ;;  %v569_v59 = vmax.f32 %v537_v52, %v564_v48 }
 0x252   :  { %v3151_v55 = vunpack.i.h.bf16 %v3149_v53  ;;  %v3150_v56 = vunpack.i.l.bf16 %v3149_v53  ;;  %v3146_v57 = vunpack.i.h.bf16 %v3144_v54  ;;  %v3145_v60 = vunpack.i.l.bf16 %v3144_v54 }
 0x254   :  { %v590_v62 = vsel %vm236_vm7, %v3150_v56, %v3151_v55  ;;  %v594_v58 = vsel %vm236_vm7, %v3145_v60, %v3146_v57  ;;  %v592_v61 = vsel %vm236_vm7, %v3146_v57, %v3150_v56  ;;  %v596_v63 = vsel %vm236_vm7, %v3151_v55, %v3145_v60 }
 0x255   :  { %v600_v5 = vmax.f32 %v568_v6, %v590_v62  ;;  %v598_v9 = vmax.f32 %v566_v7, %v594_v58  ;;  %v3159_v10 = vpop.permute.xlu1 %3158  ;;  %v3154_v12 = vpop.permute.xlu0 %3153  ;;  %v599_v13 = vmax.f32 %v567_v11, %v592_v61  ;;  %v601_v14 = vmax.f32 %v569_v59, %v596_v63  ;;  %v765_v58 = vld [vmem:[%s4106_s6 + $0x40] sm:$0xff]  ;;  %v766_v61 = vld [vmem:[%s4106_s6 + $0x48] sm:$0xff] }
 0x256   :  { %v3161_v15 = vunpack.i.h.bf16 %v3159_v10  ;;  %v3160_v16 = vunpack.i.l.bf16 %v3159_v10  ;;  %v3156_v17 = vunpack.i.h.bf16 %v3154_v12  ;;  %v3155_v18 = vunpack.i.l.bf16 %v3154_v12  ;;  %v3942_v12 = vld [vmem:[%s4102_s2] sm:$0xff] }
 0x257   :  { %670 = vmatprep.mubr.f32.mxu0 %v599_v13  ;;  %745 = vmatprep.mubr.f32.mxu1 %v601_v14  ;;  %v3326_v60 = vmov 0.0|0.0   ;;  %v826_v13 = vcombine.high %v3942_v12, %v3942_v12 }
 0x258   :  { %671 = vmatmul.mubr.f32.vlgmr.msra.gmra.mrb[4].mxu0 %v598_v9  ;;  %v527_v19 = vsel %vm197_vm4, %v3160_v16, %v3161_v15  ;;  %v529_v20 = vsel %vm197_vm4, %v3156_v17, %v3160_v16  ;;  %v531_v25 = vsel %vm197_vm4, %v3155_v18, %v3156_v17  ;;  %v533_v26 = vsel %vm197_vm4, %v3161_v15, %v3155_v18  ;;  %v757_v16 = vld [vmem:[%s4106_s6] sm:$0xff]  ;;  %v758_v17 = vld [vmem:[%s4106_s6 + $0x8] sm:$0xff] }
 0x259   :  { %746 = vmatmul.mubr.f32.vlgmr.msra.gmra.mrb[4].mxu1 %v600_v5  ;;  %v3169_v31 = vpop.permute.xlu1 %3168  ;;  %v3164_v32 = vpop.permute.xlu0 %3163  ;;  %v540_v41 = vmax.f32 %v444_v28, %v527_v19  ;;  %v539_v42 = vmax.f32 %v443_v29, %v529_v20  ;;  %v538_v43 = vmax.f32 %v442_v27, %v531_v25  ;;  %v541_v44 = vmax.f32 %v445_v30, %v533_v26  ;;  %v759_v26 = vld [vmem:[%s4106_s6 + $0x10] sm:$0xff] }
 0x25a   :  { %v3171_v33 = vunpack.i.h.bf16 %v3169_v31  ;;  %v3170_v34 = vunpack.i.l.bf16 %v3169_v31  ;;  %v3166_v35 = vunpack.i.h.bf16 %v3164_v32  ;;  %v3165_v36 = vunpack.i.l.bf16 %v3164_v32  ;;  %2741 = vmatprep.subr.bf16.mxu0 %v3326_v60  ;;  %2768 = vmatprep.subr.bf16.mxu1 %v3326_v60  ;;  %v760_v31 = vld [vmem:[%s4106_s6 + $0x18] sm:$0xff] }
 0x25c   :  { %v559_v37 = vsel %vm223_vm5, %v3170_v34, %v3171_v33  ;;  %v561_v38 = vsel %vm223_vm5, %v3166_v35, %v3170_v34  ;;  %v563_v39 = vsel %vm223_vm5, %v3165_v36, %v3166_v35  ;;  %v565_v40 = vsel %vm223_vm5, %v3171_v33, %v3165_v36  ;;  %v761_v36 = vld [vmem:[%s4106_s6 + $0x20] sm:$0xff] }
 0x25d   :  { %v3179_v3 = vpop.permute.xlu1 %3178  ;;  %v3174_v45 = vpop.permute.xlu0 %3173  ;;  %v571_v0 = vmax.f32 %v539_v42, %v561_v38  ;;  %v573_v48 = vmax.f32 %v541_v44, %v565_v40  ;;  %v570_v49 = vmax.f32 %v538_v43, %v563_v39  ;;  %v572_v22 = vmax.f32 %v540_v41, %v559_v37  ;;  %v762_v38 = vld [vmem:[%s4106_s6 + $0x28] sm:$0xff]  ;;  %v763_v43 = vld [vmem:[%s4106_s6 + $0x30] sm:$0xff]  ;;  %v764_v44 = vld [vmem:[%s4106_s6 + $0x38] sm:$0xff] }
 0x25e   :  { %v3181_v2 = vunpack.i.h.bf16 %v3179_v3  ;;  %v3180_v46 = vunpack.i.l.bf16 %v3179_v3  ;;  %v3176_v1 = vunpack.i.h.bf16 %v3174_v45  ;;  %v3175_v47 = vunpack.i.l.bf16 %v3174_v45 }
 0x260   :  { %v593_v23 = vsel %vm236_vm7, %v3176_v1, %v3180_v46  ;;  %v597_v21 = vsel %vm236_vm7, %v3181_v2, %v3175_v47  ;;  %v595_v24 = vsel %vm236_vm7, %v3175_v47, %v3176_v1  ;;  %v591_v27 = vsel %vm236_vm7, %v3180_v46, %v3181_v2 }
 0x261   :  { %v603_v28 = vmax.f32 %v571_v0, %v593_v23  ;;  %v605_v29 = vmax.f32 %v573_v48, %v597_v21  ;;  %v602_v30 = vmax.f32 %v570_v49, %v595_v24  ;;  %v604_v50 = vmax.f32 %v572_v22, %v591_v27  ;;  %v768_v0 = vld [vmem:[%s4106_s6 + $0x58] sm:$0xff]  ;;  %v767_v49 = vld [vmem:[%s4106_s6 + $0x50] sm:$0xff]  ;;  %v770_v21 = vld [vmem:[%s4106_s6 + $0x68] sm:$0xff] }
 0x263   :  { %675 = vmatprep.mubr.f32.mxu0 %v603_v28  ;;  %750 = vmatprep.mubr.f32.mxu1 %v605_v29  ;;  %v769_v28 = vld [vmem:[%s4106_s6 + $0x60] sm:$0xff] }
 0x264   :  { %676 = vmatmul.mubr.f32.gmra.mrb[6].mxu0 %v602_v30  ;;  %751 = vmatmul.mubr.f32.gmra.mrb[6].mxu1 %v604_v50 }
 0x265   :  { %2366 = vmatprep.mubr.msk.f32.mxu0 %vm827_vm9, %v826_v13  ;;  %v904_v13 = vld [vmem:[#allocation4 + $0x18] sm:$0xff]  ;;  %2559 = vmatprep.mubr.msk.f32.mxu1 %vm3331_vm10, %v3323_v4 }
 0x32b   :  { %v2424_v51 = vpop.f32.mrb[4].mxu0 }
 0x32c   :  { %v2462_v52 = vpop.f32.mrb[4].mxu1  ;;  %v2425_v53 = vpop.f32.mrb[5].mxu0 }
 0x32d   :  { %v2426_v54 = vadd.f32 %v2425_v53, %v2424_v51  ;;  %v2463_v55 = vpop.f32.mrb[5].mxu1  ;;  %v772_v51 = vld [vmem:[%s4106_s6 + $0x78] sm:$0xff] }
 0x32e   :  { %v2464_v56 = vadd.f32 %v2463_v55, %v2462_v52 }
 0x330   :  { %v748_v57 = vadd.f32 %v2464_v56, %v2426_v54  ;;  %v771_v54 = vld [vmem:[%s4106_s6 + $0x70] sm:$0xff] }
 0x332   :  { %775 = vrot.lane.b32.xlu0 %v748_v57, %s3325_s7  ;;  %v3926_v5 = vmul.f32 %v765_v58, %v748_v57 }
 0x336   :  { %779 = vrot.lane.b32.xlu0 %v748_v57, %s3310_s28 }
 0x337   :  { %v2427_v8 = vpop.f32.mrb[6].mxu0  ;;  %v2465_v6 = vpop.f32.mrb[6].mxu1 }
 0x338   :  { %v2428_v7 = vpop.f32.mrb[7].mxu0  ;;  %v2466_v11 = vpop.f32.mrb[7].mxu1 }
 0x339   :  { %v2429_v59 = vadd.f32 %v2428_v7, %v2427_v8  ;;  %v2467_v62 = vadd.f32 %v2466_v11, %v2465_v6  ;;  %v773_v7 = vld [vmem:[%s4106_s6 + $0x80] sm:$0xff] }
 0x33a   :  { %783 = vrot.lane.b32.xlu0 %v748_v57, %s3327_s24 }
 0x33b   :  { %v753_v63 = vadd.f32 %v2467_v62, %v2429_v59 }
 0x33d   :  { %777 = vrot.lane.b32.xlu1 %v753_v63, %s3325_s7  ;;  %v3928_v9 = vmul.f32 %v766_v61, %v753_v63 }
 0x33e   :  { %787 = vrot.lane.b32.xlu0 %v748_v57, %s3319_s0 }
 0x33f   :  { %v2754_v10 = vpack.c.bf16 %v3928_v9, %v3926_v5  ;;  %v902_v5 = vld [vmem:[#allocation4 + $0x8] sm:$0xff]  ;;  %v903_v9 = vld [vmem:[#allocation4 + $0x10] sm:$0xff] }
 0x341   :  { %781 = vrot.lane.b32.xlu1 %v753_v63, %s3310_s28 }
 0x342   :  { %791 = vrot.lane.b32.xlu0 %v748_v57, %s3320_s22 }
 0x345   :  { %785 = vrot.lane.b32.xlu1 %v753_v63, %s3327_s24 }
 0x346   :  { %795 = vrot.lane.b32.xlu0 %v748_v57, %s3328_s14 }
 0x349   :  { %789 = vrot.lane.b32.xlu1 %v753_v63, %s3319_s0 }
 0x34a   :  { %799 = vrot.lane.b32.xlu0 %v748_v57, %s3329_s15 }
 0x34d   :  { %793 = vrot.lane.b32.xlu1 %v753_v63, %s3320_s22 }
 0x34e   :  { %803 = vrot.lane.b32.xlu0 %v748_v57, %s3330_s9  ;;  %v774_v57 = vld [vmem:[%s4106_s6 + $0x88] sm:$0xff] }
 0x351   :  { %797 = vrot.lane.b32.xlu1 %v753_v63, %s3328_s14 }
 0x355   :  { %801 = vrot.lane.b32.xlu1 %v753_v63, %s3329_s15 }
 0x359   :  { %805 = vrot.lane.b32.xlu1 %v753_v63, %s3330_s9  ;;  %v901_v63 = vld [vmem:[#allocation4] sm:$0xff] }
 0x3a4   :  { %v776_v14 = vpop.permute.xlu0 %775 }
 0x3a5   :  { %v807_v20 = vmul.f32 %v776_v14, %v757_v16  ;;  %v2772_v14 = vpack.c.bf16 %v904_v13, %v903_v9  ;;  %v906_v16 = vld [vmem:[#allocation4 + $0x28] sm:$0xff]  ;;  %v1010_v9 = vld [vmem:[#allocation6 + $0x70] sm:$0xff] }
 0x3a8   :  { %v780_v15 = vpop.permute.xlu0 %779 }
 0x3a9   :  { %v809_v34 = vmul.f32 %v780_v15, %v759_v26  ;;  %v905_v15 = vld [vmem:[#allocation4 + $0x20] sm:$0xff] }
 0x3ac   :  { %v784_v18 = vpop.permute.xlu0 %783 }
 0x3ad   :  { %v811_v41 = vmul.f32 %v784_v18, %v761_v36  ;;  %v907_v18 = vld [vmem:[#allocation4 + $0x30] sm:$0xff] }
 0x3af   :  { %v778_v19 = vpop.permute.xlu1 %777 }
 0x3b0   :  { %v808_v25 = vmul.f32 %v778_v19, %v758_v17  ;;  %v788_v37 = vpop.permute.xlu0 %787  ;;  %v2775_v17 = vpack.c.bf16 %v906_v16, %v905_v15  ;;  %v908_v19 = vld [vmem:[#allocation4 + $0x38] sm:$0xff] }
 0x3b1   :  { %v813_v46 = vmul.f32 %v788_v37, %v763_v43  ;;  %v915_v37 = vld [vmem:[#allocation4 + $0x70] sm:$0xff] }
 0x3b2   :  { %v2742_v32 = vpack.c.bf16 %v808_v25, %v807_v20  ;;  %v2778_v20 = vpack.c.bf16 %v908_v19, %v907_v18  ;;  %v910_v25 = vld [vmem:[#allocation4 + $0x48] sm:$0xff] }
 0x3b3   :  { %v782_v33 = vpop.permute.xlu1 %781 }
 0x3b4   :  { %v810_v35 = vmul.f32 %v782_v33, %v760_v31  ;;  %2743 = vmatpush1.bf16.msra.mxu0 %v2742_v32  ;;  %v792_v45 = vpop.permute.xlu0 %791  ;;  %v911_v31 = vld [vmem:[#allocation4 + $0x50] sm:$0xff]  ;;  %v912_v32 = vld [vmem:[#allocation4 + $0x58] sm:$0xff] }
 0x3b5   :  { %2744 = vmatprep.subr.bf16.mxu0 %v3326_v60  ;;  %v817_v27 = vmul.f32 %v792_v45, %v767_v49  ;;  %v2784_v33 = vpack.c.bf16 %v912_v32, %v911_v31 }
 0x3b6   :  { %v2745_v39 = vpack.c.bf16 %v810_v35, %v809_v34  ;;  %v913_v34 = vld [vmem:[#allocation4 + $0x60] sm:$0xff]  ;;  %v914_v35 = vld [vmem:[#allocation4 + $0x68] sm:$0xff] }
 0x3b7   :  { %v786_v40 = vpop.permute.xlu1 %785  ;;  %v2787_v36 = vpack.c.bf16 %v914_v35, %v913_v34 }
 0x3b8   :  { %v812_v42 = vmul.f32 %v786_v40, %v762_v38  ;;  %2746 = vmatpush1.bf16.msra.mxu0 %v2745_v39  ;;  %v796_v22 = vpop.permute.xlu0 %795  ;;  %v916_v38 = vld [vmem:[#allocation4 + $0x78] sm:$0xff] }
 0x3b9   :  { %2747 = vmatprep.subr.bf16.mxu0 %v3326_v60  ;;  %v819_v53 = vmul.f32 %v796_v22, %v769_v28  ;;  %v2790_v39 = vpack.c.bf16 %v916_v38, %v915_v37  ;;  %v2370_v22 = vld [vmem:[%s4103_s3 + $0x10] sm:$0xff]  ;;  %v996_v28 = vld [vmem:[#allocation6] sm:$0xff] }
 0x3ba   :  { %v2748_v3 = vpack.c.bf16 %v812_v42, %v811_v41 }
 0x3bb   :  { %v790_v2 = vpop.permute.xlu1 %789 }
 0x3bc   :  { %v814_v1 = vmul.f32 %v790_v2, %v764_v44  ;;  %2749 = vmatpush1.bf16.msra.mxu0 %v2748_v3  ;;  %v800_v50 = vpop.permute.xlu0 %799 }
 0x3bd   :  { %2750 = vmatprep.subr.bf16.mxu0 %v3326_v60  ;;  %v821_v6 = vmul.f32 %v800_v50, %v771_v54  ;;  %v1001_v54 = vld [vmem:[#allocation6 + $0x28] sm:$0xff] }
 0x3be   :  { %v2751_v47 = vpack.c.bf16 %v814_v1, %v813_v46  ;;  %v1012_v1 = vld [vmem:[%s4103_s3] sm:$0xff] }
 0x3bf   :  { %v794_v48 = vpop.permute.xlu1 %793 }
 0x3c0   :  { %2752 = vmatpush1.bf16.msra.mxu0 %v2751_v47  ;;  %v818_v23 = vmul.f32 %v794_v48, %v768_v0  ;;  %v804_v11 = vpop.permute.xlu0 %803  ;;  %v2375_v47 = vld [vmem:[%s4103_s3 + $0x20] sm:$0xff]  ;;  %v1013_v48 = vld [vmem:[%s4103_s3 + $0x8] sm:$0xff] }
 0x3c1   :  { %2753 = vmatprep.subr.bf16.mxu0 %v3326_v60  ;;  %v823_v58 = vmul.f32 %v804_v11, %v773_v7  ;;  %v1005_v7 = vld [vmem:[#allocation6 + $0x48] sm:$0xff] }
 0x3c2   :  { %v2757_v29 = vpack.c.bf16 %v818_v23, %v817_v27  ;;  %v2376_v23 = vld [vmem:[%s4103_s3 + $0x28] sm:$0xff]  ;;  %v2381_v27 = vld [vmem:[%s4103_s3 + $0x38] sm:$0xff] }
 0x3c3   :  { %v798_v24 = vpop.permute.xlu1 %797 }
 0x3c4   :  { %2755 = vmatpush1.bf16.msra.mxu0 %v2754_v10  ;;  %v820_v30 = vmul.f32 %v798_v24, %v770_v21  ;;  %v2769_v10 = vpack.c.bf16 %v902_v5, %v901_v63  ;;  %v2371_v21 = vld [vmem:[%s4103_s3 + $0x18] sm:$0xff]  ;;  %v2380_v24 = vld [vmem:[%s4103_s3 + $0x30] sm:$0xff]  ;;  %v1009_v63 = vld [vmem:[#allocation6 + $0x68] sm:$0xff]  ;;  %s3332_s3 = smov 64  }
 0x3c5   :  { %2756 = vmatprep.subr.bf16.mxu0 %v3326_v60 }
 0x3c6   :  { %v2760_v55 = vpack.c.bf16 %v820_v30, %v819_v53  ;;  %2770 = vmatpush3.bf16.msra.mxu1 %v2769_v10  ;;  %v998_v30 = vld [vmem:[#allocation6 + $0x10] sm:$0xff]  ;;  %v1000_v53 = vld [vmem:[#allocation6 + $0x20] sm:$0xff]  ;;  %v1011_v10 = vld [vmem:[#allocation6 + $0x78] sm:$0xff] }
 0x3c7   :  { %v802_v52 = vpop.permute.xlu1 %801  ;;  %2771 = vmatprep.subr.bf16.mxu1 %v3326_v60  ;;  %v2820_v13 = vpack.c.bf16 %v1011_v10, %v1010_v9  ;;  %v1504_v9 = vld [vmem:[#allocation7 + $0x150] sm:$0xff] }
 0x3c8   :  { %2758 = vmatpush1.bf16.msra.mxu0 %v2757_v29  ;;  %v822_v56 = vmul.f32 %v802_v52, %v772_v51  ;;  %v997_v29 = vld [vmem:[#allocation6 + $0x8] sm:$0xff]  ;;  %v999_v51 = vld [vmem:[#allocation6 + $0x18] sm:$0xff]  ;;  %v1508_v10 = vld [vmem:[#allocation7 + $0x170] sm:$0xff] }
 0x3c9   :  { %2759 = vmatprep.subr.bf16.mxu0 %v3326_v60  ;;  %v2792_v50 = vpack.c.bf16 %v997_v29, %v996_v28  ;;  %v2796_v52 = vpack.c.bf16 %v999_v51, %v998_v30  ;;  %v1481_v28 = vld [vmem:[#allocation7 + $0x98] sm:$0xff]  ;;  %v1484_v51 = vld [vmem:[#allocation7 + $0xb0] sm:$0xff] }
 0x3ca   :  { %v2763_v59 = vpack.c.bf16 %v822_v56, %v821_v6  ;;  %2773 = vmatpush3.bf16.msra.mxu1 %v2772_v14  ;;  %v1002_v56 = vld [vmem:[#allocation6 + $0x30] sm:$0xff]  ;;  %v1004_v6 = vld [vmem:[#allocation6 + $0x40] sm:$0xff]  ;;  %v1485_v29 = vld [vmem:[#allocation7 + $0xb8] sm:$0xff] }
 0x3cb   :  { %v806_v8 = vpop.permute.xlu1 %805  ;;  %2774 = vmatprep.subr.bf16.mxu1 %v3326_v60  ;;  %v2808_v11 = vpack.c.bf16 %v1005_v7, %v1004_v6  ;;  %v2972_v30 = vpack.c.bf16 %v1485_v29, %v1481_v28  ;;  %v1497_v6 = vld [vmem:[#allocation7 + $0x118] sm:$0xff]  ;;  %v1560_v29 = vld [vmem:[#allocation7 + $0x310] sm:$0xff] }
 0x3cc   :  { %2761 = vmatpush1.bf16.msra.mxu0 %v2760_v55  ;;  %v824_v62 = vmul.f32 %v806_v8, %v774_v57  ;;  %v2800_v55 = vpack.c.bf16 %v1001_v54, %v1000_v53  ;;  %v1003_v57 = vld [vmem:[#allocation6 + $0x38] sm:$0xff] }
 0x3cd   :  { %2762 = vmatprep.subr.bf16.mxu0 %v3326_v60  ;;  %v2804_v8 = vpack.c.bf16 %v1003_v57, %v1002_v56  ;;  %v1489_v53 = vld [vmem:[#allocation7 + $0xd8] sm:$0xff]  ;;  %v1488_v56 = vld [vmem:[#allocation7 + $0xd0] sm:$0xff] }
 0x3ce   :  { %v2766_v61 = vpack.c.bf16 %v824_v62, %v823_v58  ;;  %2776 = vmatpush3.bf16.msra.mxu1 %v2775_v17  ;;  %v1007_v62 = vld [vmem:[#allocation6 + $0x58] sm:$0xff]  ;;  %v1492_v57 = vld [vmem:[#allocation7 + $0xf0] sm:$0xff] }
 0x3cf   :  { %2777 = vmatprep.subr.bf16.mxu1 %v3326_v60  ;;  %v1493_v54 = vld [vmem:[#allocation7 + $0xf8] sm:$0xff] }
 0x3d0   :  { %2764 = vmatpush1.bf16.msra.mxu0 %v2763_v59  ;;  %v1006_v59 = vld [vmem:[#allocation6 + $0x50] sm:$0xff]  ;;  %v1501_v7 = vld [vmem:[#allocation7 + $0x138] sm:$0xff] }
 0x3d1   :  { %2765 = vmatprep.subr.bf16.mxu0 %v3326_v60  ;;  %v2812_v58 = vpack.c.bf16 %v1007_v62, %v1006_v59  ;;  %v1496_v59 = vld [vmem:[#allocation7 + $0x110] sm:$0xff] }
 0x3d2   :  { %2779 = vmatpush3.bf16.msra.mxu1 %v2778_v20  ;;  %v1500_v62 = vld [vmem:[#allocation7 + $0x130] sm:$0xff] }
 0x3d3   :  { %2780 = vmatprep.subr.bf16.mxu1 %v3326_v60 }
 0x3d4   :  { %2767 = vmatpush1.bf16.msra.mxu0 %v2766_v61  ;;  %v1008_v61 = vld [vmem:[#allocation6 + $0x60] sm:$0xff] }
 0x3d5   :  { %v2816_v5 = vpack.c.bf16 %v1009_v63, %v1008_v61  ;;  %v1505_v61 = vld [vmem:[#allocation7 + $0x158] sm:$0xff] }
 0x3d6   :  { %v1509_v63 = vld [vmem:[#allocation7 + $0x178] sm:$0xff] }
 0x3d7   :  { %895 = vmatmul.mubr.f32.vlgmr.msra.gmra.mrb[8].mxu0 %v3942_v12  ;;  %v909_v12 = vld [vmem:[#allocation4 + $0x40] sm:$0xff] }
 0x3d8   :  { %v2781_v26 = vpack.c.bf16 %v910_v25, %v909_v12  ;;  %2564 = vmatprep.mubr.msk.f32.mxu0 %vm1014_vm11, %v1012_v1 }
 0x3da   :  { %2782 = vmatpush3.bf16.msra.mxu1 %v2781_v26 }
 0x3db   :  { %2783 = vmatprep.subr.bf16.mxu1 %v3326_v60 }
 0x3de   :  { %2785 = vmatpush3.bf16.msra.mxu1 %v2784_v33 }
 0x3df   :  { %2786 = vmatprep.subr.bf16.mxu1 %v3326_v60 }
 0x3e2   :  { %2788 = vmatpush3.bf16.msra.mxu1 %v2787_v36 }
 0x3e3   :  { %2789 = vmatprep.subr.bf16.mxu1 %v3326_v60 }
 0x3e6   :  { %2791 = vmatpush3.bf16.msra.mxu1 %v2790_v39 }
 0x4aa   :  { %v896_v40 = vpop.f32.mrb[8].mxu0 }
 0x4ab   :  { %v900_v41 = vmax.f32 %v896_v40, 0.0  ;;  %v898_v42 = vpop.f32.mrb[9].mxu0 }
 0x4ad   :  { %920 = vrot.lane.b32.xlu1 %v900_v41, %s3329_s15  ;;  %917 = vrot.lane.b32.xlu0 %v900_v41, %s3320_s22 }
 0x4b1   :  { %923 = vrot.lane.b32.xlu0 %v900_v41, %s3330_s9 }
 0x51f   :  { %v918_v43 = vpop.permute.xlu0 %917  ;;  %v921_v3 = vpop.permute.xlu1 %920 }
 0x520   :  { %v919_v44 = vmax.f32 %v900_v41, %v918_v43 }
 0x522   :  { %v922_v45 = vmax.f32 %v919_v44, %v921_v3 }
 0x523   :  { %v924_v2 = vpop.permute.xlu0 %923 }
 0x524   :  { %v925_v46 = vmax.f32 %v922_v45, %v924_v2  ;;  %v1465_v2 = vld [vmem:[#allocation7 + $0x18] sm:$0xff] }
 0x526   :  { %2560 = vmatmul.mubr.f32.vlgmr.msra.gmra.mrb[8].mxu1 %v925_v46  ;;  %v1469_v46 = vld [vmem:[#allocation7 + $0x38] sm:$0xff] }
 0x527   :  { %2574 = vmatprep.mubr.msk.f32.mxu1 %vm1014_vm11, %v2375_v47  ;;  %v2964_v1 = vpack.c.bf16 %v1469_v46, %v1465_v2  ;;  %v1464_v47 = vld [vmem:[#allocation7 + $0x10] sm:$0xff] }
 0x528   :  { %v1544_v46 = vld [vmem:[#allocation7 + $0x290] sm:$0xff] }
 0x5f9   :  { %v992_v0 = vpop.f32.mrb[8].mxu1 }
 0x5fa   :  { %v2561_v49 = vpop.f32.mrb[9].mxu1  ;;  %2562 = vmatprep.subr.msk.mxu0 %vm1021_vm12, %v992_v0  ;;  %2572 = vmatprep.subr.msk.mxu1 %vm1021_vm12, %v992_v0 }
 0x5fb   :  { %2563 = vmatpush3.msk.msra.mxu0 %vm1021_vm12, %v992_v0  ;;  %2573 = vmatpush3.msk.msra.mxu1 %vm1021_vm12, %v992_v0  ;;  %v1473_v49 = vld [vmem:[#allocation7 + $0x58] sm:$0xff] }
 0x5fc   :  { %2565 = vmatmul.mubr.msk.f32.vlgmr.msra.gmra.mrb[10].mxu0 %vm1014_vm11, %v1013_v48  ;;  %2567 = vmatprep.subr.msk.mxu0 %vm1021_vm12, %v992_v0 }
 0x5fd   :  { %2568 = vmatpush3.msk.msra.mxu0 %vm1021_vm12, %v992_v0  ;;  %2569 = vmatprep.mubr.msk.f32.mxu0 %vm1014_vm11, %v2370_v22  ;;  %v1477_v22 = vld [vmem:[#allocation7 + $0x78] sm:$0xff] }
 0x5fe   :  { %2577 = vmatprep.subr.msk.mxu0 %vm1021_vm12, %v992_v0  ;;  %2575 = vmatmul.mubr.msk.f32.vlgmr.msra.gmra.mrb[10].mxu1 %vm1014_vm11, %v2376_v23  ;;  %v2968_v23 = vpack.c.bf16 %v1477_v22, %v1473_v49  ;;  %v1552_v22 = vld [vmem:[#allocation7 + $0x2d0] sm:$0xff] }
 0x5ff   :  { %2793 = vmatprep.subr.bf16.mxu1 %v2792_v50 }
 0x600   :  { %2570 = vmatmul.mubr.msk.f32.vlgmr.msra.gmra.mrb[12].mxu0 %vm1014_vm11, %v2371_v21  ;;  %2795 = vmatpush3.bf16.msra.mxu1 %v2792_v50  ;;  %v1472_v21 = vld [vmem:[#allocation7 + $0x50] sm:$0xff] }
 0x601   :  { %2578 = vmatpush3.msk.msra.mxu0 %vm1021_vm12, %v992_v0  ;;  %2579 = vmatprep.mubr.msk.f32.mxu0 %vm1014_vm11, %v2380_v24  ;;  %v1468_v0 = vld [vmem:[#allocation7 + $0x30] sm:$0xff] }
 0x602   :  { %2824 = vmatprep.subr.bf16.mxu0 %v3326_v60  ;;  %2797 = vmatprep.subr.bf16.mxu1 %v2796_v52  ;;  %v2966_v48 = vpack.c.bf16 %v1468_v0, %v1464_v47  ;;  %v1476_v24 = vld [vmem:[#allocation7 + $0x70] sm:$0xff]  ;;  %v1553_v0 = vld [vmem:[#allocation7 + $0x2d8] sm:$0xff] }
 0x603   :  { %v1480_v50 = vld [vmem:[#allocation7 + $0x90] sm:$0xff] }
 0x604   :  { %2580 = vmatmul.mubr.msk.f32.vlgmr.msra.gmra.mrb[14].mxu0 %vm1014_vm11, %v2381_v27  ;;  %2799 = vmatpush3.bf16.msra.mxu1 %v2796_v52  ;;  %v2970_v27 = vpack.c.bf16 %v1476_v24, %v1472_v21  ;;  %v2974_v52 = vpack.c.bf16 %v1484_v51, %v1480_v50  ;;  %v1561_v24 = vld [vmem:[#allocation7 + $0x318] sm:$0xff] }
 0x605   :  { %2621 = vmatprep.mubr.msk.f32.mxu0 %vm3331_vm10, %v3323_v4  ;;  %2801 = vmatprep.subr.bf16.mxu1 %v2800_v55  ;;  %v1569_v51 = vld [vmem:[#allocation7 + $0x358] sm:$0xff] }
 0x608   :  { %2803 = vmatpush3.bf16.msra.mxu1 %v2800_v55  ;;  %v2976_v55 = vpack.c.bf16 %v1493_v54, %v1489_v53  ;;  %v1568_v54 = vld [vmem:[#allocation7 + $0x350] sm:$0xff] }
 0x609   :  { %2805 = vmatprep.subr.bf16.mxu1 %v2804_v8 }
 0x60c   :  { %2807 = vmatpush3.bf16.msra.mxu1 %v2804_v8  ;;  %v2978_v8 = vpack.c.bf16 %v1492_v57, %v1488_v56  ;;  %v1577_v57 = vld [vmem:[#allocation7 + $0x398] sm:$0xff] }
 0x60d   :  { %2809 = vmatprep.subr.bf16.mxu1 %v2808_v11 }
 0x610   :  { %2811 = vmatpush3.bf16.msra.mxu1 %v2808_v11  ;;  %v2980_v11 = vpack.c.bf16 %v1501_v7, %v1497_v6  ;;  %v1576_v7 = vld [vmem:[#allocation7 + $0x390] sm:$0xff] }
 0x611   :  { %2813 = vmatprep.subr.bf16.mxu1 %v2812_v58 }
 0x614   :  { %2815 = vmatpush3.bf16.msra.mxu1 %v2812_v58  ;;  %v2982_v58 = vpack.c.bf16 %v1500_v62, %v1496_v59  ;;  %v1585_v62 = vld [vmem:[#allocation7 + $0x3d8] sm:$0xff] }
 0x615   :  { %2817 = vmatprep.subr.bf16.mxu1 %v2816_v5 }
 0x618   :  { %2819 = vmatpush3.bf16.msra.mxu1 %v2816_v5  ;;  %v2984_v5 = vpack.c.bf16 %v1509_v63, %v1505_v61 }
 0x619   :  { %2821 = vmatprep.subr.bf16.mxu1 %v2820_v13 }
 0x61c   :  { %2823 = vmatpush3.bf16.msra.mxu1 %v2820_v13  ;;  %v2986_v13 = vpack.c.bf16 %v1508_v10, %v1504_v9 }
 0x61d   :  { %2965 = vmatprep.subr.bf16.mxu1 %v2964_v1  ;;  %v1548_v1 = vld [vmem:[#allocation7 + $0x2b0] sm:$0xff] }
 0x61e   :  { %v3006_v47 = vpack.c.bf16 %v1548_v1, %v1544_v46 }
 0x6cf   :  { %v2566_v14 = vpop.f32.mrb[10].mxu0 }
 0x6d0   :  { %v1091_v15 = vpop.f32.mrb[11].mxu0 }
 0x6d1   :  { %v2576_v16 = vpop.f32.mrb[10].mxu1 }
 0x6d2   :  { %v1259_v17 = vpop.f32.mrb[11].mxu1 }
 0x6d3   :  { %v2571_v18 = vpop.f32.mrb[12].mxu0  ;;  %v3187_v19 = vpack.i.bf16 %v2576_v16, %v1259_v17  ;;  %v1512_v17 = vld [vmem:[#allocation7 + $0x190] sm:$0xff] }
 0x6d4   :  { %v1175_v20 = vpop.f32.mrb[13].mxu0 }
 0x6d5   :  { %v3182_v12 = vpack.i.bf16 %v2571_v18, %v1175_v20  ;;  %3188 = vrot.lane.b32.xlu0 %v3187_v19, %s3332_s3  ;;  %v1516_v18 = vld [vmem:[#allocation7 + $0x1b0] sm:$0xff]  ;;  %v1521_v20 = vld [vmem:[#allocation7 + $0x1d8] sm:$0xff] }
 0x6d6   :  { %v2990_v19 = vpack.c.bf16 %v1516_v18, %v1512_v17  ;;  %v1467_v17 = vld [vmem:[#allocation7 + $0x28] sm:$0xff] }
 0x6d7   :  { %3183 = vrot.lane.b32.xlu1 %v3182_v12, %s3313_s18  ;;  %v2581_v25 = vpop.f32.mrb[14].mxu0  ;;  %v1525_v12 = vld [vmem:[#allocation7 + $0x1f8] sm:$0xff]  ;;  %v2388_v18 = vld [vmem:[%s4104_s4 + $0x8] sm:$0xf] }
 0x6d8   :  { %v1343_v26 = vpop.f32.mrb[15].mxu0 }
 0x6d9   :  { %v3192_v31 = vpack.i.bf16 %v2581_v25, %v1343_v26  ;;  %v2992_v25 = vpack.c.bf16 %v1525_v12, %v1521_v20  ;;  %v1520_v26 = vld [vmem:[#allocation7 + $0x1d0] sm:$0xff]  ;;  %v1462_v20 = vld [vmem:[#allocation7] sm:$0xff] }
 0x6da   :  { %v1466_v12 = vld [vmem:[#allocation7 + $0x20] sm:$0xff] }
 0x6db   :  { %3193 = vrot.lane.b32.xlu1 %v3192_v31, %s3333_s27  ;;  %v1524_v31 = vld [vmem:[#allocation7 + $0x1f0] sm:$0xff] }
 0x747   :  { %v3189_v32 = vpop.permute.xlu0 %3188 }
 0x748   :  { %v3191_v36 = vunpack.i.h.bf16 %v3189_v32  ;;  %v3190_v37 = vunpack.i.l.bf16 %v3189_v32  ;;  %v2994_v32 = vpack.c.bf16 %v1524_v31, %v1520_v26  ;;  %v1475_v26 = vld [vmem:[#allocation7 + $0x68] sm:$0xff] }
 0x749   :  { %v3184_v33 = vpop.permute.xlu1 %3183  ;;  %v2390_v31 = vld [vmem:[%s4104_s4 + $0xc] sm:$0xf] }
 0x74a   :  { %v3186_v34 = vunpack.i.h.bf16 %v3184_v33  ;;  %v3185_v35 = vunpack.i.l.bf16 %v3184_v33  ;;  %v1529_v33 = vld [vmem:[#allocation7 + $0x218] sm:$0xff] }
 0x74c   :  { %v1378_v38 = vsel %vm1376_vm13, %v2566_v14, %v3186_v34  ;;  %v1377_v39 = vsel %vm1376_vm13, %v1091_v15, %v3185_v35  ;;  %v1513_v14 = vld [vmem:[#allocation7 + $0x198] sm:$0xff] }
 0x74d   :  { %v3194_v40 = vpop.permute.xlu1 %3193  ;;  %v1381_v43 = vsel %vm1379_vm14, %v1378_v38, %v3191_v36  ;;  %v1380_v44 = vsel %vm1379_vm14, %v1377_v39, %v3190_v37  ;;  %v1517_v15 = vld [vmem:[#allocation7 + $0x1b8] sm:$0xff]  ;;  %v1528_v36 = vld [vmem:[#allocation7 + $0x210] sm:$0xff] }
 0x74e   :  { %v3196_v41 = vunpack.i.h.bf16 %v3194_v40  ;;  %v3195_v42 = vunpack.i.l.bf16 %v3194_v40  ;;  %v2988_v16 = vpack.c.bf16 %v1517_v15, %v1513_v14  ;;  %v1533_v34 = vld [vmem:[#allocation7 + $0x238] sm:$0xff]  ;;  %v1532_v37 = vld [vmem:[#allocation7 + $0x230] sm:$0xff]  ;;  %v1718_v14 = vld [vmem:[%s4104_s4] sm:$0xf] }
 0x74f   :  { %v2996_v35 = vpack.c.bf16 %v1533_v34, %v1529_v33  ;;  %v2998_v38 = vpack.c.bf16 %v1532_v37, %v1528_v36  ;;  %v1537_v39 = vld [vmem:[#allocation7 + $0x258] sm:$0xff]  ;;  %v2386_v15 = vld [vmem:[%s4104_s4 + $0x4] sm:$0xf]  ;;  %v1483_v36 = vld [vmem:[#allocation7 + $0xa8] sm:$0xff] }
 0x750   :  { %v1383_v3 = vsel %vm1382_vm15, %v1380_v44, %v3195_v42  ;;  %v1384_v45 = vsel %vm1382_vm15, %v1381_v43, %v3196_v41  ;;  %v1541_v40 = vld [vmem:[#allocation7 + $0x278] sm:$0xff]  ;;  %v1536_v42 = vld [vmem:[#allocation7 + $0x250] sm:$0xff]  ;;  %v1470_v34 = vld [vmem:[#allocation7 + $0x40] sm:$0xff] }
 0x751   :  { %2614 = vmatprep.mubr.f32.mxu1 %v1383_v3  ;;  %v3000_v41 = vpack.c.bf16 %v1541_v40, %v1537_v39  ;;  %v1540_v43 = vld [vmem:[#allocation7 + $0x270] sm:$0xff]  ;;  %v1545_v3 = vld [vmem:[#allocation7 + $0x298] sm:$0xff]  ;;  %v1478_v39 = vld [vmem:[#allocation7 + $0x80] sm:$0xff] }
 0x752   :  { %2615 = vmatmul.mubr.f32.vlgmr.msra.gmra.mrb[12].mxu1 %v1384_v45  ;;  %v3002_v44 = vpack.c.bf16 %v1540_v43, %v1536_v42  ;;  %v1549_v45 = vld [vmem:[#allocation7 + $0x2b8] sm:$0xff]  ;;  %v1482_v40 = vld [vmem:[#allocation7 + $0xa0] sm:$0xff] }
 0x753   :  { %2967 = vmatpush1.bf16.msra.mxu1 %v2966_v48  ;;  %v3004_v2 = vpack.c.bf16 %v1549_v45, %v1545_v3  ;;  %v1557_v48 = vld [vmem:[#allocation7 + $0x2f8] sm:$0xff]  ;;  %v2846_v42 = vpack.c.bf16 %v1482_v40, %v1478_v39  ;;  %v1490_v3 = vld [vmem:[#allocation7 + $0xe0] sm:$0xff]  ;;  %v1495_v45 = vld [vmem:[#allocation7 + $0x108] sm:$0xff] }
 0x754   :  { %2969 = vmatprep.subr.bf16.mxu1 %v2968_v23  ;;  %v3008_v49 = vpack.c.bf16 %v1557_v48, %v1553_v0  ;;  %v1556_v23 = vld [vmem:[#allocation7 + $0x2f0] sm:$0xff]  ;;  %v1498_v0 = vld [vmem:[#allocation7 + $0x120] sm:$0xff]  ;;  %v1503_v48 = vld [vmem:[#allocation7 + $0x148] sm:$0xff] }
 0x755   :  { %v3010_v21 = vpack.c.bf16 %v1556_v23, %v1552_v22 }
 0x757   :  { %2971 = vmatpush1.bf16.msra.mxu1 %v2970_v27  ;;  %v1565_v27 = vld [vmem:[#allocation7 + $0x338] sm:$0xff] }
 0x758   :  { %2973 = vmatprep.subr.bf16.mxu1 %v2972_v30  ;;  %v3012_v28 = vpack.c.bf16 %v1565_v27, %v1561_v24  ;;  %v1564_v30 = vld [vmem:[#allocation7 + $0x330] sm:$0xff]  ;;  %v1506_v24 = vld [vmem:[#allocation7 + $0x160] sm:$0xff]  ;;  %v1511_v27 = vld [vmem:[#allocation7 + $0x188] sm:$0xff] }
 0x759   :  { %v3014_v50 = vpack.c.bf16 %v1564_v30, %v1560_v29 }
 0x75b   :  { %2975 = vmatpush1.bf16.msra.mxu1 %v2974_v52  ;;  %v1573_v52 = vld [vmem:[#allocation7 + $0x378] sm:$0xff] }
 0x75c   :  { %2977 = vmatprep.subr.bf16.mxu1 %v2976_v55  ;;  %v3016_v53 = vpack.c.bf16 %v1573_v52, %v1569_v51  ;;  %v1572_v55 = vld [vmem:[#allocation7 + $0x370] sm:$0xff]  ;;  %v1514_v51 = vld [vmem:[#allocation7 + $0x1a0] sm:$0xff]  ;;  %v1519_v52 = vld [vmem:[#allocation7 + $0x1c8] sm:$0xff] }
 0x75d   :  { %v3018_v56 = vpack.c.bf16 %v1572_v55, %v1568_v54 }
 0x75f   :  { %2979 = vmatpush1.bf16.msra.mxu1 %v2978_v8  ;;  %v1581_v8 = vld [vmem:[#allocation7 + $0x3b8] sm:$0xff] }
 0x760   :  { %2981 = vmatprep.subr.bf16.mxu1 %v2980_v11  ;;  %v3020_v6 = vpack.c.bf16 %v1581_v8, %v1577_v57  ;;  %v1580_v11 = vld [vmem:[#allocation7 + $0x3b0] sm:$0xff]  ;;  %v1522_v57 = vld [vmem:[#allocation7 + $0x1e0] sm:$0xff]  ;;  %v1527_v8 = vld [vmem:[#allocation7 + $0x208] sm:$0xff] }
 0x761   :  { %v3022_v59 = vpack.c.bf16 %v1580_v11, %v1576_v7 }
 0x763   :  { %2983 = vmatpush1.bf16.msra.mxu1 %v2982_v58  ;;  %v1589_v58 = vld [vmem:[#allocation7 + $0x3f8] sm:$0xff] }
 0x764   :  { %2985 = vmatprep.subr.bf16.mxu1 %v2984_v5  ;;  %v3024_v61 = vpack.c.bf16 %v1589_v58, %v1585_v62  ;;  %v1530_v62 = vld [vmem:[#allocation7 + $0x220] sm:$0xff]  ;;  %v1535_v58 = vld [vmem:[#allocation7 + $0x248] sm:$0xff] }
 0x767   :  { %2987 = vmatpush1.bf16.msra.mxu1 %v2986_v13 }
 0x768   :  { %2989 = vmatprep.subr.bf16.mxu1 %v2988_v16  ;;  %v1463_v16 = vld [vmem:[#allocation7 + $0x8] sm:$0xff] }
 0x76b   :  { %2991 = vmatpush1.bf16.msra.mxu1 %v2990_v19  ;;  %v2836_v19 = vpack.c.bf16 %v1467_v17, %v1463_v16  ;;  %v1542_v17 = vld [vmem:[#allocation7 + $0x280] sm:$0xff] }
 0x76c   :  { %2993 = vmatprep.subr.bf16.mxu1 %v2992_v25  ;;  %v1471_v25 = vld [vmem:[#allocation7 + $0x48] sm:$0xff] }
 0x76d   :  { %v2840_v33 = vpack.c.bf16 %v1475_v26, %v1471_v25  ;;  %v1550_v26 = vld [vmem:[#allocation7 + $0x2c0] sm:$0xff] }
 0x76f   :  { %2995 = vmatpush1.bf16.msra.mxu1 %v2994_v32  ;;  %v2838_v32 = vpack.c.bf16 %v1466_v12, %v1462_v20  ;;  %v1555_v20 = vld [vmem:[#allocation7 + $0x2e8] sm:$0xff] }
 0x770   :  { %2997 = vmatprep.subr.bf16.mxu1 %v2996_v35  ;;  %v1479_v35 = vld [vmem:[#allocation7 + $0x88] sm:$0xff] }
 0x773   :  { %2999 = vmatpush1.bf16.msra.mxu1 %v2998_v38  ;;  %v2844_v38 = vpack.c.bf16 %v1483_v36, %v1479_v35  ;;  %v1558_v35 = vld [vmem:[#allocation7 + $0x300] sm:$0xff] }
 0x774   :  { %3001 = vmatprep.subr.bf16.mxu1 %v3000_v41  ;;  %v1491_v41 = vld [vmem:[#allocation7 + $0xe8] sm:$0xff]  ;;  %v1562_v36 = vld [vmem:[#allocation7 + $0x320] sm:$0xff] }
 0x775   :  { %v2886_v39 = vpack.c.bf16 %v1562_v36, %v1558_v35  ;;  %v1619_v35 = vld [vmem:[#allocation7 + $0x4e8] sm:$0xff]  ;;  %v1617_v36 = vld [vmem:[#allocation7 + $0x4d8] sm:$0xff] }
 0x777   :  { %3003 = vmatpush1.bf16.msra.mxu1 %v3002_v44  ;;  %v1486_v44 = vld [vmem:[#allocation7 + $0xc0] sm:$0xff] }
 0x778   :  { %3005 = vmatprep.subr.bf16.mxu1 %v3004_v2  ;;  %v1499_v2 = vld [vmem:[#allocation7 + $0x128] sm:$0xff]  ;;  %v2850_v46 = vpack.c.bf16 %v1490_v3, %v1486_v44 }
 0x779   :  { %v2852_v1 = vpack.c.bf16 %v1499_v2, %v1495_v45  ;;  %v1574_v45 = vld [vmem:[#allocation7 + $0x380] sm:$0xff] }
 0x77a   :  { %v1578_v2 = vld [vmem:[#allocation7 + $0x3a0] sm:$0xff] }
 0x77b   :  { %3007 = vmatpush1.bf16.msra.mxu1 %v3006_v47  ;;  %v1494_v47 = vld [vmem:[#allocation7 + $0x100] sm:$0xff] }
 0x77c   :  { %3009 = vmatprep.subr.bf16.mxu1 %v3008_v49  ;;  %v1507_v49 = vld [vmem:[#allocation7 + $0x168] sm:$0xff]  ;;  %v2854_v22 = vpack.c.bf16 %v1498_v0, %v1494_v47  ;;  %v2894_v47 = vpack.c.bf16 %v1578_v2, %v1574_v45 }
 0x77d   :  { %v2856_v23 = vpack.c.bf16 %v1507_v49, %v1503_v48  ;;  %v1582_v48 = vld [vmem:[#allocation7 + $0x3c0] sm:$0xff]  ;;  %v1623_v45 = vld [vmem:[#allocation7 + $0x508] sm:$0xff] }
 0x77e   :  { %v1586_v49 = vld [vmem:[#allocation7 + $0x3e0] sm:$0xff] }
 0x77f   :  { %3011 = vmatpush1.bf16.msra.mxu1 %v3010_v21  ;;  %v1502_v21 = vld [vmem:[#allocation7 + $0x140] sm:$0xff] }
 0x780   :  { %3013 = vmatprep.subr.bf16.mxu1 %v3012_v28  ;;  %v1515_v28 = vld [vmem:[#allocation7 + $0x1a8] sm:$0xff]  ;;  %v2858_v29 = vpack.c.bf16 %v1506_v24, %v1502_v21  ;;  %v1588_v21 = vld [vmem:[#allocation7 + $0x3f0] sm:$0xff] }
 0x781   :  { %v2860_v30 = vpack.c.bf16 %v1515_v28, %v1511_v27  ;;  %v1591_v27 = vld [vmem:[#allocation7 + $0x408] sm:$0xff] }
 0x782   :  { %v1595_v28 = vld [vmem:[#allocation7 + $0x428] sm:$0xff] }
 0x783   :  { %3015 = vmatpush1.bf16.msra.mxu1 %v3014_v50  ;;  %v1510_v50 = vld [vmem:[#allocation7 + $0x180] sm:$0xff] }
 0x784   :  { %3017 = vmatprep.subr.bf16.mxu1 %v3016_v53  ;;  %v1523_v53 = vld [vmem:[#allocation7 + $0x1e8] sm:$0xff]  ;;  %v2862_v54 = vpack.c.bf16 %v1514_v51, %v1510_v50  ;;  %v1597_v50 = vld [vmem:[#allocation7 + $0x438] sm:$0xff] }
 0x785   :  { %v2864_v55 = vpack.c.bf16 %v1523_v53, %v1519_v52  ;;  %v1590_v52 = vld [vmem:[#allocation7 + $0x400] sm:$0xff] }
 0x786   :  { %v1594_v53 = vld [vmem:[#allocation7 + $0x420] sm:$0xff] }
 0x787   :  { %3019 = vmatpush1.bf16.msra.mxu1 %v3018_v56  ;;  %v1518_v56 = vld [vmem:[#allocation7 + $0x1c0] sm:$0xff] }
 0x788   :  { %3021 = vmatprep.subr.bf16.mxu1 %v3020_v6  ;;  %v1531_v6 = vld [vmem:[#allocation7 + $0x228] sm:$0xff]  ;;  %v2866_v7 = vpack.c.bf16 %v1522_v57, %v1518_v56  ;;  %v1596_v56 = vld [vmem:[#allocation7 + $0x430] sm:$0xff] }
 0x789   :  { %v2868_v11 = vpack.c.bf16 %v1531_v6, %v1527_v8  ;;  %v1599_v57 = vld [vmem:[#allocation7 + $0x448] sm:$0xff] }
 0x78a   :  { %v1603_v6 = vld [vmem:[#allocation7 + $0x468] sm:$0xff] }
 0x78b   :  { %3023 = vmatpush1.bf16.msra.mxu1 %v3022_v59  ;;  %v1526_v59 = vld [vmem:[#allocation7 + $0x200] sm:$0xff] }
 0x78c   :  { %3025 = vmatprep.subr.bf16.mxu1 %v3024_v61  ;;  %v1539_v61 = vld [vmem:[#allocation7 + $0x268] sm:$0xff] }
 0x825   :  { %v2616_v63 = vpop.f32.mrb[12].mxu1 }
 0x826   :  { %v1461_v5 = vmax.f32 %v2616_v63, 0.0  ;;  %v1451_v9 = vpop.f32.mrb[13].mxu1  ;;  %v2870_v63 = vpack.c.bf16 %v1530_v62, %v1526_v59  ;;  %v2902_v59 = vpack.c.bf16 %v1594_v53, %v1590_v52 }
 0x827   :  { %v1460_v10 = vmax.f32 %v1451_v9, 0.0  ;;  %v1534_v9 = vld [vmem:[#allocation7 + $0x240] sm:$0xff] }
 0x829   :  { %v2825_v13 = vpack.c.bf16 %v1461_v5, %v1460_v10  ;;  %v2872_v5 = vpack.c.bf16 %v1539_v61, %v1535_v58  ;;  %v1538_v10 = vld [vmem:[#allocation7 + $0x260] sm:$0xff] }
 0x82a   :  { %v1598_v58 = vld [vmem:[#allocation7 + $0x440] sm:$0xff] }
 0x82b   :  { %2826 = vmatpush3.bf16.msra.mxu0 %v2825_v13  ;;  %v1602_v61 = vld [vmem:[#allocation7 + $0x460] sm:$0xff] }
 0x82c   :  { %2827 = vmatprep.subr.bf16.mxu0 %v3326_v60 }
 0x82e   :  { %2622 = vmatmul.mubr.msk.f32.vlgmr.msra.gmra.mrb[16].mxu0 %vm827_vm9, %v1718_v14  ;;  %v1547_v14 = vld [vmem:[#allocation7 + $0x2a8] sm:$0xff] }
 0x82f   :  { %2829 = vmatpush3.bf16.msra.mxu0 %v2825_v13  ;;  %2628 = vmatprep.mubr.msk.f32.mxu0 %vm3331_vm10, %v3323_v4 }
 0x830   :  { %2830 = vmatprep.subr.bf16.mxu0 %v3326_v60 }
 0x832   :  { %2629 = vmatmul.mubr.msk.f32.vlgmr.msra.gmra.mrb[18].mxu0 %vm827_vm9, %v2386_v15  ;;  %v2874_v15 = vpack.c.bf16 %v1538_v10, %v1534_v9  ;;  %v1600_v10 = vld [vmem:[#allocation7 + $0x450] sm:$0xff] }
 0x833   :  { %2832 = vmatpush3.bf16.msra.mxu0 %v2825_v13  ;;  %2635 = vmatprep.mubr.msk.f32.mxu0 %vm3331_vm10, %v3323_v4 }
 0x834   :  { %2833 = vmatprep.subr.bf16.mxu0 %v3326_v60  ;;  %v1474_v60 = vld [vmem:[#allocation7 + $0x60] sm:$0xff] }
 0x835   :  { %v2842_v37 = vpack.c.bf16 %v1474_v60, %v1470_v34 }
 0x836   :  { %2636 = vmatmul.mubr.msk.f32.vlgmr.msra.gmra.mrb[20].mxu0 %vm827_vm9, %v2388_v18  ;;  %v1546_v18 = vld [vmem:[#allocation7 + $0x2a0] sm:$0xff] }
 0x837   :  { %2835 = vmatpush3.bf16.msra.mxu0 %v2825_v13  ;;  %2642 = vmatprep.mubr.msk.f32.mxu0 %vm3331_vm10, %v3323_v4  ;;  %v1487_v4 = vld [vmem:[#allocation7 + $0xc8] sm:$0xff]  ;;  %v2878_v12 = vpack.c.bf16 %v1546_v18, %v1542_v17  ;;  %v1609_v17 = vld [vmem:[#allocation7 + $0x498] sm:$0xff] }
 0x838   :  { %2837 = vmatprep.subr.bf16.mxu0 %v2836_v19  ;;  %v2848_v43 = vpack.c.bf16 %v1491_v41, %v1487_v4  ;;  %v1543_v13 = vld [vmem:[#allocation7 + $0x288] sm:$0xff]  ;;  %v1566_v4 = vld [vmem:[#allocation7 + $0x340] sm:$0xff]  ;;  %v1613_v18 = vld [vmem:[#allocation7 + $0x4b8] sm:$0xff] }
 0x839   :  { %v2876_v16 = vpack.c.bf16 %v1547_v14, %v1543_v13  ;;  %v1551_v19 = vld [vmem:[#allocation7 + $0x2c8] sm:$0xff]  ;;  %v1570_v41 = vld [vmem:[#allocation7 + $0x360] sm:$0xff]  ;;  %v1604_v13 = vld [vmem:[#allocation7 + $0x470] sm:$0xff] }
 0x83a   :  { %2643 = vmatmul.mubr.msk.f32.vlgmr.msra.gmra.mrb[22].mxu0 %vm827_vm9, %v2390_v31  ;;  %v2880_v25 = vpack.c.bf16 %v1555_v20, %v1551_v19  ;;  %v1554_v31 = vld [vmem:[#allocation7 + $0x2e0] sm:$0xff]  ;;  %v2890_v44 = vpack.c.bf16 %v1570_v41, %v1566_v4  ;;  %v1607_v14 = vld [vmem:[#allocation7 + $0x488] sm:$0xff]  ;;  %v2906_v19 = vpack.c.bf16 %v1602_v61, %v1598_v58  ;;  %v3034_v20 = vpack.c.bf16 %v1604_v13, %v1600_v10  ;;  %v1640_v13 = vld [vmem:[#allocation7 + $0x590] sm:$0xff] }
 0x83b   :  { %2839 = vmatpush1.bf16.msra.mxu0 %v2838_v32  ;;  %v1559_v32 = vld [vmem:[#allocation7 + $0x308] sm:$0xff]  ;;  %v2882_v34 = vpack.c.bf16 %v1554_v31, %v1550_v26  ;;  %v3036_v31 = vpack.c.bf16 %v1613_v18, %v1609_v17  ;;  %v1614_v4 = vld [vmem:[#allocation7 + $0x4c0] sm:$0xff]  ;;  %v1649_v17 = vld [vmem:[#allocation7 + $0x5d8] sm:$0xff] }
 0x83c   :  { %2841 = vmatprep.subr.bf16.mxu0 %v2840_v33  ;;  %v1563_v33 = vld [vmem:[#allocation7 + $0x328] sm:$0xff]  ;;  %v1618_v41 = vld [vmem:[#allocation7 + $0x4e0] sm:$0xff]  ;;  %v1653_v18 = vld [vmem:[#allocation7 + $0x5f8] sm:$0xff] }
 0x83d   :  { %v2884_v60 = vpack.c.bf16 %v1563_v33, %v1559_v32  ;;  %v1608_v32 = vld [vmem:[#allocation7 + $0x490] sm:$0xff] }
 0x83e   :  { %v1612_v33 = vld [vmem:[#allocation7 + $0x4b0] sm:$0xff] }
 0x83f   :  { %2843 = vmatpush1.bf16.msra.mxu0 %v2842_v37  ;;  %v1567_v37 = vld [vmem:[#allocation7 + $0x348] sm:$0xff] }
 0x840   :  { %2845 = vmatprep.subr.bf16.mxu0 %v2844_v38  ;;  %v1571_v38 = vld [vmem:[#allocation7 + $0x368] sm:$0xff] }
 0x841   :  { %v2888_v40 = vpack.c.bf16 %v1571_v38, %v1567_v37  ;;  %v1621_v37 = vld [vmem:[#allocation7 + $0x4f8] sm:$0xff] }
 0x843   :  { %2847 = vmatpush1.bf16.msra.mxu0 %v2846_v42  ;;  %v1575_v42 = vld [vmem:[#allocation7 + $0x388] sm:$0xff] }
 0x844   :  { %2849 = vmatprep.subr.bf16.mxu0 %v2848_v43  ;;  %v1579_v43 = vld [vmem:[#allocation7 + $0x3a8] sm:$0xff] }
 0x845   :  { %v2892_v3 = vpack.c.bf16 %v1579_v43, %v1575_v42  ;;  %v3040_v43 = vpack.c.bf16 %v1621_v37, %v1617_v36  ;;  %v1657_v36 = vld [vmem:[#allocation7 + $0x618] sm:$0xff] }
 0x846   :  { %v1661_v37 = vld [vmem:[#allocation7 + $0x638] sm:$0xff] }
 0x847   :  { %2851 = vmatpush1.bf16.msra.mxu0 %v2850_v46  ;;  %v1583_v46 = vld [vmem:[#allocation7 + $0x3c8] sm:$0xff] }
 0x848   :  { %2853 = vmatprep.subr.bf16.mxu0 %v2852_v1  ;;  %v1587_v1 = vld [vmem:[#allocation7 + $0x3e8] sm:$0xff] }
 0x849   :  { %v2896_v0 = vpack.c.bf16 %v1587_v1, %v1583_v46  ;;  %v1627_v46 = vld [vmem:[#allocation7 + $0x528] sm:$0xff]  ;;  %v1625_v1 = vld [vmem:[#allocation7 + $0x518] sm:$0xff] }
 0x84b   :  { %2855 = vmatpush1.bf16.msra.mxu0 %v2854_v22  ;;  %v1584_v22 = vld [vmem:[#allocation7 + $0x3d0] sm:$0xff] }
 0x84c   :  { %2857 = vmatprep.subr.bf16.mxu0 %v2856_v23  ;;  %v2898_v23 = vpack.c.bf16 %v1586_v49, %v1582_v48  ;;  %v3026_v24 = vpack.c.bf16 %v1588_v21, %v1584_v22  ;;  %v2914_v48 = vpack.c.bf16 %v1618_v41, %v1614_v4  ;;  %v1622_v22 = vld [vmem:[#allocation7 + $0x500] sm:$0xff]  ;;  %v2916_v21 = vpack.c.bf16 %v1627_v46, %v1623_v45  ;;  %v1667_v45 = vld [vmem:[#allocation7 + $0x668] sm:$0xff]  ;;  %v1669_v46 = vld [vmem:[#allocation7 + $0x678] sm:$0xff] }
 0x84d   :  { %v1658_v4 = vld [vmem:[#allocation7 + $0x620] sm:$0xff] }
 0x84e   :  { %3027 = vmatpush1.bf16.msra.mxu1 %v3026_v24 }
 0x84f   :  { %2859 = vmatpush1.bf16.msra.mxu0 %v2858_v29  ;;  %v1593_v29 = vld [vmem:[#allocation7 + $0x418] sm:$0xff] }
 0x850   :  { %2861 = vmatprep.subr.bf16.mxu0 %v2860_v30  ;;  %v2900_v30 = vpack.c.bf16 %v1595_v28, %v1591_v27  ;;  %v3028_v51 = vpack.c.bf16 %v1597_v50, %v1593_v29  ;;  %v1624_v27 = vld [vmem:[#allocation7 + $0x510] sm:$0xff]  ;;  %v1631_v29 = vld [vmem:[#allocation7 + $0x548] sm:$0xff]  ;;  %v1633_v50 = vld [vmem:[#allocation7 + $0x558] sm:$0xff] }
 0x851   :  { %v1628_v28 = vld [vmem:[#allocation7 + $0x530] sm:$0xff] }
 0x852   :  { %3029 = vmatprep.subr.bf16.mxu1 %v3028_v51  ;;  %v1637_v51 = vld [vmem:[#allocation7 + $0x578] sm:$0xff]  ;;  %v3046_v53 = vpack.c.bf16 %v1628_v28, %v1624_v27  ;;  %v1675_v27 = vld [vmem:[#allocation7 + $0x6a8] sm:$0xff] }
 0x853   :  { %2863 = vmatpush1.bf16.msra.mxu0 %v2862_v54  ;;  %v1673_v28 = vld [vmem:[#allocation7 + $0x698] sm:$0xff] }
 0x854   :  { %2865 = vmatprep.subr.bf16.mxu0 %v2864_v55  ;;  %v1592_v55 = vld [vmem:[#allocation7 + $0x410] sm:$0xff] }
 0x855   :  { %v3030_v62 = vpack.c.bf16 %v1596_v56, %v1592_v55  ;;  %v1634_v55 = vld [vmem:[#allocation7 + $0x560] sm:$0xff] }
 0x857   :  { %2867 = vmatpush1.bf16.msra.mxu0 %v2866_v7  ;;  %v1601_v7 = vld [vmem:[#allocation7 + $0x458] sm:$0xff] }
 0x858   :  { %2869 = vmatprep.subr.bf16.mxu0 %v2868_v11  ;;  %v1605_v11 = vld [vmem:[#allocation7 + $0x478] sm:$0xff] }
 0x859   :  { %v3032_v9 = vpack.c.bf16 %v1605_v11, %v1601_v7  ;;  %v1639_v7 = vld [vmem:[#allocation7 + $0x588] sm:$0xff] }
 0x85a   :  { %v1643_v11 = vld [vmem:[#allocation7 + $0x5a8] sm:$0xff] }
 0x85b   :  { %2871 = vmatpush1.bf16.msra.mxu0 %v2870_v63 }
 0x85c   :  { %2873 = vmatprep.subr.bf16.mxu0 %v2872_v5  ;;  %v2904_v5 = vpack.c.bf16 %v1603_v6, %v1599_v57  ;;  %v3048_v57 = vpack.c.bf16 %v1637_v51, %v1633_v50  ;;  %v1636_v6 = vld [vmem:[#allocation7 + $0x570] sm:$0xff]  ;;  %v1670_v51 = vld [vmem:[#allocation7 + $0x680] sm:$0xff] }
 0x85f   :  { %2875 = vmatpush1.bf16.msra.mxu0 %v2874_v15 }
 0x860   :  { %2877 = vmatprep.subr.bf16.mxu0 %v2876_v16  ;;  %v1611_v16 = vld [vmem:[#allocation7 + $0x4a8] sm:$0xff] }
 0x861   :  { %v2908_v26 = vpack.c.bf16 %v1611_v16, %v1607_v14  ;;  %v1644_v14 = vld [vmem:[#allocation7 + $0x5b0] sm:$0xff]  ;;  %v1651_v16 = vld [vmem:[#allocation7 + $0x5e8] sm:$0xff] }
 0x863   :  { %2879 = vmatpush1.bf16.msra.mxu0 %v2878_v12  ;;  %v1606_v12 = vld [vmem:[#allocation7 + $0x480] sm:$0xff] }
 0x864   :  { %2881 = vmatprep.subr.bf16.mxu0 %v2880_v25  ;;  %v1610_v25 = vld [vmem:[#allocation7 + $0x4a0] sm:$0xff] }
 0x867   :  { %2883 = vmatpush1.bf16.msra.mxu0 %v2882_v34  ;;  %v1615_v34 = vld [vmem:[#allocation7 + $0x4c8] sm:$0xff] }
 0x868   :  { %2885 = vmatprep.subr.bf16.mxu0 %v2884_v60  ;;  %v2912_v42 = vpack.c.bf16 %v1619_v35, %v1615_v34  ;;  %v1655_v34 = vld [vmem:[#allocation7 + $0x608] sm:$0xff] }
 0x869   :  { %v1659_v35 = vld [vmem:[#allocation7 + $0x628] sm:$0xff] }
 0x86a   :  { %v2932_v41 = vpack.c.bf16 %v1659_v35, %v1655_v34  ;;  %v1701_v34 = vld [vmem:[#allocation7 + $0x778] sm:$0xff] }
 0x86b   :  { %2887 = vmatpush1.bf16.msra.mxu0 %v2886_v39  ;;  %v2910_v39 = vpack.c.bf16 %v1610_v25, %v1606_v12  ;;  %v1646_v12 = vld [vmem:[#allocation7 + $0x5c0] sm:$0xff] }
 0x86c   :  { %2889 = vmatprep.subr.bf16.mxu0 %v2888_v40  ;;  %v3038_v40 = vpack.c.bf16 %v1612_v33, %v1608_v32  ;;  %v1650_v25 = vld [vmem:[#allocation7 + $0x5e0] sm:$0xff]  ;;  %v1648_v32 = vld [vmem:[#allocation7 + $0x5d0] sm:$0xff] }
 0x86d   :  { %v1652_v33 = vld [vmem:[#allocation7 + $0x5f0] sm:$0xff] }
 0x86f   :  { %2891 = vmatpush1.bf16.msra.mxu0 %v2890_v44  ;;  %v1616_v44 = vld [vmem:[#allocation7 + $0x4d0] sm:$0xff] }
 0x870   :  { %2893 = vmatprep.subr.bf16.mxu0 %v2892_v3  ;;  %v1620_v3 = vld [vmem:[#allocation7 + $0x4f0] sm:$0xff] }
 0x871   :  { %v3042_v49 = vpack.c.bf16 %v1620_v3, %v1616_v44  ;;  %v1660_v44 = vld [vmem:[#allocation7 + $0x630] sm:$0xff]  ;;  %v1663_v3 = vld [vmem:[#allocation7 + $0x648] sm:$0xff] }
 0x873   :  { %2895 = vmatpush1.bf16.msra.mxu0 %v2894_v47  ;;  %v1629_v47 = vld [vmem:[#allocation7 + $0x538] sm:$0xff] }
 0x874   :  { %2897 = vmatprep.subr.bf16.mxu0 %v2896_v0  ;;  %v3044_v24 = vpack.c.bf16 %v1629_v47, %v1625_v1 }
 0x877   :  { %2899 = vmatpush1.bf16.msra.mxu0 %v2898_v23  ;;  %v1626_v23 = vld [vmem:[#allocation7 + $0x520] sm:$0xff] }
 0x878   :  { %2901 = vmatprep.subr.bf16.mxu0 %v2900_v30  ;;  %v1635_v30 = vld [vmem:[#allocation7 + $0x568] sm:$0xff]  ;;  %v2918_v52 = vpack.c.bf16 %v1626_v23, %v1622_v22  ;;  %v1664_v23 = vld [vmem:[#allocation7 + $0x650] sm:$0xff] }
 0x879   :  { %v2920_v56 = vpack.c.bf16 %v1635_v30, %v1631_v29  ;;  %v1677_v29 = vld [vmem:[#allocation7 + $0x6b8] sm:$0xff] }
 0x901   :  { %v1788_v54 = vpop.f32.mrb[16].mxu0 }
 0x902   :  { %v2623_v8 = vpop.f32.mrb[17].mxu0 }
 0x903   :  { %v1632_v8 = vld [vmem:[#allocation7 + $0x550] sm:$0xff] }
 0x904   :  { %v3050_v61 = vpack.c.bf16 %v1636_v6, %v1632_v8  ;;  %v1683_v8 = vld [vmem:[#allocation7 + $0x6e8] sm:$0xff]  ;;  %v1681_v6 = vld [vmem:[#allocation7 + $0x6d8] sm:$0xff] }
 0x905   :  { %v1863_v63 = vpop.f32.mrb[18].mxu0 }
 0x906   :  { %2081 = vmatprep.mubr.f32.mxu0 %v1863_v63  ;;  %2223 = vmatprep.mubr.f32.mxu1 %v1863_v63  ;;  %v2630_v15 = vpop.f32.mrb[19].mxu0  ;;  %v1638_v63 = vld [vmem:[#allocation7 + $0x580] sm:$0xff] }
 0x907   :  { %2082 = vmatmul.mubr.f32.vlgmr.msra.gmra.mrb[24].mxu0 %v1788_v54  ;;  %2224 = vmatmul.mubr.f32.vlgmr.msra.gmra.mrb[14].mxu1 %v1788_v54  ;;  %v1630_v54 = vld [vmem:[#allocation7 + $0x540] sm:$0xff]  ;;  %v1647_v15 = vld [vmem:[#allocation7 + $0x5c8] sm:$0xff] }
 0x908   :  { %2903 = vmatpush1.bf16.msra.mxu0 %v2902_v59  ;;  %3031 = vmatpush1.bf16.msra.mxu1 %v3030_v62  ;;  %v1641_v59 = vld [vmem:[#allocation7 + $0x598] sm:$0xff]  ;;  %v2922_v58 = vpack.c.bf16 %v1634_v55, %v1630_v54  ;;  %v3068_v54 = vpack.c.bf16 %v1677_v29, %v1673_v28  ;;  %v1672_v55 = vld [vmem:[#allocation7 + $0x690] sm:$0xff]  ;;  %v1710_v29 = vld [vmem:[#allocation7 + $0x7c0] sm:$0xff] }
 0x909   :  { %2905 = vmatprep.subr.bf16.mxu0 %v2904_v5  ;;  %3033 = vmatprep.subr.bf16.mxu1 %v3032_v9  ;;  %v4090_v60 = vpop.f32.mrb[20].mxu0  ;;  %v1645_v62 = vld [vmem:[#allocation7 + $0x5b8] sm:$0xff]  ;;  %v1642_v5 = vld [vmem:[#allocation7 + $0x5a0] sm:$0xff]  ;;  %v2924_v9 = vpack.c.bf16 %v1643_v11, %v1639_v7 }
 0x90a   :  { %v2637_v38 = vpop.f32.mrb[21].mxu0  ;;  %v3052_v10 = vpack.c.bf16 %v1645_v62, %v1641_v59  ;;  %v1685_v7 = vld [vmem:[#allocation7 + $0x6f8] sm:$0xff]  ;;  %v1678_v62 = vld [vmem:[#allocation7 + $0x6c0] sm:$0xff] }
 0x90b   :  { %v2930_v38 = vpack.c.bf16 %v1650_v25, %v1646_v12  ;;  %v1688_v25 = vld [vmem:[#allocation7 + $0x710] sm:$0xff] }
 0x90c   :  { %2907 = vmatpush1.bf16.msra.mxu0 %v2906_v19  ;;  %3035 = vmatpush1.bf16.msra.mxu1 %v3034_v20  ;;  %v2926_v19 = vpack.c.bf16 %v1642_v5, %v1638_v63  ;;  %v3054_v20 = vpack.c.bf16 %v1644_v14, %v1640_v13  ;;  %v3072_v63 = vpack.c.bf16 %v1685_v7, %v1681_v6  ;;  %v1680_v5 = vld [vmem:[#allocation7 + $0x6d0] sm:$0xff]  ;;  %v1691_v13 = vld [vmem:[#allocation7 + $0x728] sm:$0xff]  ;;  %v1689_v14 = vld [vmem:[#allocation7 + $0x718] sm:$0xff] }
 0x90d   :  { %2909 = vmatprep.subr.bf16.mxu0 %v2908_v26  ;;  %3037 = vmatprep.subr.bf16.mxu1 %v3036_v31  ;;  %v2013_v2 = vpop.f32.mrb[22].mxu0  ;;  %v2928_v26 = vpack.c.bf16 %v1651_v16, %v1647_v15  ;;  %v3056_v31 = vpack.c.bf16 %v1653_v18, %v1649_v17  ;;  %v1693_v15 = vld [vmem:[#allocation7 + $0x738] sm:$0xff]  ;;  %v1686_v18 = vld [vmem:[#allocation7 + $0x700] sm:$0xff] }
 0x90e   :  { %2152 = vmatprep.mubr.f32.mxu0 %v2013_v2  ;;  %2294 = vmatprep.mubr.f32.mxu1 %v2013_v2  ;;  %v2644_v0 = vpop.f32.mrb[23].mxu0  ;;  %v1665_v2 = vld [vmem:[#allocation7 + $0x658] sm:$0xff]  ;;  %v3076_v12 = vpack.c.bf16 %v1693_v15, %v1689_v14 }
 0x90f   :  { %v1662_v0 = vld [vmem:[#allocation7 + $0x640] sm:$0xff]  ;;  %v3064_v22 = vpack.c.bf16 %v1669_v46, %v1665_v2 }
 0x910   :  { %2911 = vmatpush1.bf16.msra.mxu0 %v2910_v39  ;;  %3039 = vmatpush1.bf16.msra.mxu1 %v3038_v40  ;;  %v3058_v39 = vpack.c.bf16 %v1652_v33, %v1648_v32  ;;  %v1654_v40 = vld [vmem:[#allocation7 + $0x600] sm:$0xff]  ;;  %v1699_v32 = vld [vmem:[#allocation7 + $0x768] sm:$0xff]  ;;  %v1697_v33 = vld [vmem:[#allocation7 + $0x758] sm:$0xff] }
 0x911   :  { %2913 = vmatprep.subr.bf16.mxu0 %v2912_v42  ;;  %3041 = vmatprep.subr.bf16.mxu1 %v3040_v43  ;;  %v3060_v42 = vpack.c.bf16 %v1661_v37, %v1657_v36  ;;  %v1656_v43 = vld [vmem:[#allocation7 + $0x610] sm:$0xff]  ;;  %v2934_v1 = vpack.c.bf16 %v1658_v4, %v1654_v40  ;;  %v1694_v37 = vld [vmem:[#allocation7 + $0x740] sm:$0xff]  ;;  %v3080_v40 = vpack.c.bf16 %v1701_v34, %v1697_v33 }
 0x912   :  { %v3062_v47 = vpack.c.bf16 %v1660_v44, %v1656_v43  ;;  %v1696_v4 = vld [vmem:[#allocation7 + $0x750] sm:$0xff]  ;;  %v1707_v43 = vld [vmem:[#allocation7 + $0x7a8] sm:$0xff]  ;;  %v1705_v44 = vld [vmem:[#allocation7 + $0x798] sm:$0xff] }
 0x913   :  { %v1702_v46 = vld [vmem:[#allocation7 + $0x780] sm:$0xff] }
 0x914   :  { %2915 = vmatpush1.bf16.msra.mxu0 %v2914_v48  ;;  %3043 = vmatpush1.bf16.msra.mxu1 %v3042_v49  ;;  %v1666_v48 = vld [vmem:[#allocation7 + $0x660] sm:$0xff]  ;;  %v2936_v49 = vpack.c.bf16 %v1667_v45, %v1663_v3  ;;  %v1709_v3 = vld [vmem:[#allocation7 + $0x7b8] sm:$0xff] }
 0x915   :  { %2917 = vmatprep.subr.bf16.mxu0 %v2916_v21  ;;  %3045 = vmatprep.subr.bf16.mxu1 %v3044_v24  ;;  %v1668_v21 = vld [vmem:[#allocation7 + $0x670] sm:$0xff]  ;;  %v1671_v24 = vld [vmem:[#allocation7 + $0x688] sm:$0xff]  ;;  %v2938_v30 = vpack.c.bf16 %v1666_v48, %v1662_v0  ;;  %v3084_v0 = vpack.c.bf16 %v1709_v3, %v1705_v44 }
 0x916   :  { %v3066_v50 = vpack.c.bf16 %v1668_v21, %v1664_v23  ;;  %v1704_v48 = vld [vmem:[#allocation7 + $0x790] sm:$0xff]  ;;  %v1715_v23 = vld [vmem:[#allocation7 + $0x7e8] sm:$0xff]  ;;  %v1713_v21 = vld [vmem:[#allocation7 + $0x7d8] sm:$0xff] }
 0x918   :  { %2919 = vmatpush1.bf16.msra.mxu0 %v2918_v52  ;;  %3047 = vmatpush1.bf16.msra.mxu1 %v3046_v53  ;;  %v1674_v52 = vld [vmem:[#allocation7 + $0x6a0] sm:$0xff]  ;;  %v2940_v53 = vpack.c.bf16 %v1675_v27, %v1671_v24  ;;  %v1717_v24 = vld [vmem:[#allocation7 + $0x7f8] sm:$0xff] }
 0x919   :  { %2921 = vmatprep.subr.bf16.mxu0 %v2920_v56  ;;  %3049 = vmatprep.subr.bf16.mxu1 %v3048_v57  ;;  %v1676_v56 = vld [vmem:[#allocation7 + $0x6b0] sm:$0xff]  ;;  %v1679_v57 = vld [vmem:[#allocation7 + $0x6c8] sm:$0xff]  ;;  %v2942_v11 = vpack.c.bf16 %v1674_v52, %v1670_v51  ;;  %v1714_v51 = vld [vmem:[#allocation7 + $0x7e0] sm:$0xff] }
 0x91a   :  { %v3070_v59 = vpack.c.bf16 %v1676_v56, %v1672_v55  ;;  %v1712_v52 = vld [vmem:[#allocation7 + $0x7d0] sm:$0xff] }
 0x91c   :  { %2923 = vmatpush1.bf16.msra.mxu0 %v2922_v58  ;;  %3051 = vmatpush1.bf16.msra.mxu1 %v3050_v61  ;;  %v1682_v58 = vld [vmem:[#allocation7 + $0x6e0] sm:$0xff]  ;;  %v2944_v61 = vpack.c.bf16 %v1683_v8, %v1679_v57 }
 0x91d   :  { %2925 = vmatprep.subr.bf16.mxu0 %v2924_v9  ;;  %3053 = vmatprep.subr.bf16.mxu1 %v3052_v10  ;;  %v1684_v9 = vld [vmem:[#allocation7 + $0x6f0] sm:$0xff]  ;;  %v1687_v10 = vld [vmem:[#allocation7 + $0x708] sm:$0xff]  ;;  %v2946_v16 = vpack.c.bf16 %v1682_v58, %v1678_v62 }
 0x91e   :  { %v3074_v17 = vpack.c.bf16 %v1684_v9, %v1680_v5 }
 0x920   :  { %2927 = vmatpush1.bf16.msra.mxu0 %v2926_v19  ;;  %3055 = vmatpush1.bf16.msra.mxu1 %v3054_v20  ;;  %v1690_v19 = vld [vmem:[#allocation7 + $0x720] sm:$0xff]  ;;  %v2948_v20 = vpack.c.bf16 %v1691_v13, %v1687_v10 }
 0x921   :  { %2929 = vmatprep.subr.bf16.mxu0 %v2928_v26  ;;  %3057 = vmatprep.subr.bf16.mxu1 %v3056_v31  ;;  %v1692_v26 = vld [vmem:[#allocation7 + $0x730] sm:$0xff]  ;;  %v1695_v31 = vld [vmem:[#allocation7 + $0x748] sm:$0xff]  ;;  %v2950_v35 = vpack.c.bf16 %v1690_v19, %v1686_v18 }
 0x922   :  { %v3078_v36 = vpack.c.bf16 %v1692_v26, %v1688_v25 }
 0x924   :  { %2931 = vmatpush1.bf16.msra.mxu0 %v2930_v38  ;;  %3059 = vmatpush1.bf16.msra.mxu1 %v3058_v39  ;;  %v1698_v38 = vld [vmem:[#allocation7 + $0x760] sm:$0xff]  ;;  %v2952_v39 = vpack.c.bf16 %v1699_v32, %v1695_v31 }
 0x925   :  { %2933 = vmatprep.subr.bf16.mxu0 %v2932_v41  ;;  %3061 = vmatprep.subr.bf16.mxu1 %v3060_v42  ;;  %v1700_v41 = vld [vmem:[#allocation7 + $0x770] sm:$0xff]  ;;  %v1703_v42 = vld [vmem:[#allocation7 + $0x788] sm:$0xff]  ;;  %v2954_v45 = vpack.c.bf16 %v1698_v38, %v1694_v37 }
 0x926   :  { %v3082_v2 = vpack.c.bf16 %v1700_v41, %v1696_v4 }
 0x928   :  { %2935 = vmatpush1.bf16.msra.mxu0 %v2934_v1  ;;  %3063 = vmatpush1.bf16.msra.mxu1 %v3062_v47  ;;  %v1706_v1 = vld [vmem:[#allocation7 + $0x7a0] sm:$0xff]  ;;  %v2956_v47 = vpack.c.bf16 %v1707_v43, %v1703_v42 }
 0x929   :  { %2937 = vmatprep.subr.bf16.mxu0 %v2936_v49  ;;  %3065 = vmatprep.subr.bf16.mxu1 %v3064_v22  ;;  %v1708_v49 = vld [vmem:[#allocation7 + $0x7b0] sm:$0xff]  ;;  %v1711_v22 = vld [vmem:[#allocation7 + $0x7c8] sm:$0xff]  ;;  %v2958_v27 = vpack.c.bf16 %v1706_v1, %v1702_v46 }
 0x92a   :  { %v3086_v28 = vpack.c.bf16 %v1708_v49, %v1704_v48 }
 0x92c   :  { %2939 = vmatpush1.bf16.msra.mxu0 %v2938_v30  ;;  %3067 = vmatpush1.bf16.msra.mxu1 %v3066_v50  ;;  %v2960_v30 = vpack.c.bf16 %v1715_v23, %v1711_v22  ;;  %v3088_v50 = vpack.c.bf16 %v1717_v24, %v1713_v21 }
 0x92d   :  { %2941 = vmatprep.subr.bf16.mxu0 %v2940_v53  ;;  %3069 = vmatprep.subr.bf16.mxu1 %v3068_v54  ;;  %v1716_v53 = vld [vmem:[#allocation7 + $0x7f0] sm:$0xff]  ;;  %v2962_v54 = vpack.c.bf16 %v1714_v51, %v1710_v29 }
 0x92e   :  { %v3090_v55 = vpack.c.bf16 %v1716_v53, %v1712_v52 }
 0x930   :  { %2943 = vmatpush1.bf16.msra.mxu0 %v2942_v11  ;;  %3071 = vmatpush1.bf16.msra.mxu1 %v3070_v59 }
 0x931   :  { %2945 = vmatprep.subr.bf16.mxu0 %v2944_v61  ;;  %3073 = vmatprep.subr.bf16.mxu1 %v3072_v63 }
 0x934   :  { %2947 = vmatpush1.bf16.msra.mxu0 %v2946_v16  ;;  %3075 = vmatpush1.bf16.msra.mxu1 %v3074_v17 }
 0x935   :  { %2949 = vmatprep.subr.bf16.mxu0 %v2948_v20  ;;  %3077 = vmatprep.subr.bf16.mxu1 %v3076_v12 }
 0x938   :  { %2951 = vmatpush1.bf16.msra.mxu0 %v2950_v35  ;;  %3079 = vmatpush1.bf16.msra.mxu1 %v3078_v36 }
 0x939   :  { %2953 = vmatprep.subr.bf16.mxu0 %v2952_v39  ;;  %3081 = vmatprep.subr.bf16.mxu1 %v3080_v40 }
 0x93c   :  { %2955 = vmatpush1.bf16.msra.mxu0 %v2954_v45  ;;  %3083 = vmatpush1.bf16.msra.mxu1 %v3082_v2 }
 0x93d   :  { %2957 = vmatprep.subr.bf16.mxu0 %v2956_v47  ;;  %3085 = vmatprep.subr.bf16.mxu1 %v3084_v0 }
 0x940   :  { %2959 = vmatpush1.bf16.msra.mxu0 %v2958_v27  ;;  %3087 = vmatpush1.bf16.msra.mxu1 %v3086_v28 }
 0x941   :  { %2961 = vmatprep.subr.bf16.mxu0 %v2960_v30  ;;  %3089 = vmatprep.subr.bf16.mxu1 %v3088_v50 }
 0x944   :  { %2963 = vmatpush1.bf16.msra.mxu0 %v2962_v54  ;;  %3091 = vmatpush1.bf16.msra.mxu1 %v3090_v55 }
 0x947   :  { %2153 = vmatmul.mubr.f32.vlgmr.msra.gmra.mrb[24].mxu0 %v4090_v60  ;;  %2295 = vmatmul.mubr.f32.vlgmr.msra.gmra.mrb[14].mxu1 %v4090_v60 }
 0xa1a   :  { %v2154_v56 = vpop.f32.mrb[24].mxu0  ;;  %v2296_v57 = vpop.f32.mrb[14].mxu1 }
 0xa1b   :  { %v2301_v8 = vand.u32 2147483647, %v2154_v56  ;;  %v2303_v6 = vand.u32 2147483647, %v2296_v57  ;;  %v2156_v7 = vpop.f32.mrb[25].mxu0  ;;  %v2298_v11 = vpop.f32.mrb[15].mxu1 }
 0xa1c   :  { %v2302_v58 = vand.u32 2147483647, %v2156_v7  ;;  %v2304_v61 = vand.u32 2147483647, %v2298_v11  ;;  %vm2325_vm0 = vcmp.ge.f32.partialorder %v2154_v56, 0.0  ;;  %vm2327_vm1 = vcmp.ge.f32.partialorder %v2296_v57, 0.0 }
 0xa1d   :  { %v2305_v59 = vsub.f32 0.0, %v2301_v8  ;;  %v2307_v62 = vsub.f32 0.0, %v2303_v6  ;;  %vm2326_vm2 = vcmp.ge.f32.partialorder %v2156_v7, 0.0  ;;  %vm2328_vm3 = vcmp.ge.f32.partialorder %v2298_v11, 0.0 }
 0xa1e   :  { %v2306_v9 = vsub.f32 0.0, %v2302_v58  ;;  %v2308_v10 = vsub.f32 0.0, %v2304_v61 }
 0xa1f   :  { %v2309_v63 = vmul.f32 1.442695, %v2305_v59  ;;  %v2313_v5 = vmul.f32 1.442695, %v2307_v62 }
 0xa20   :  { %v2311_v13 = vmul.f32 1.442695, %v2306_v9  ;;  %v2315_v14 = vmul.f32 1.442695, %v2308_v10 }
 0xa21   :  { %3198 = vpow2.f32 %v2309_v63 }
 0xa22   :  { %3200 = vpow2.f32 %v2313_v5 }
 0xa23   :  { %3202 = vpow2.f32 %v2311_v13 }
 0xa24   :  { %3204 = vpow2.f32 %v2315_v14 }
 0xa2b   :  { %v3199_v60 = vpop.eup %3198 }
 0xa2c   :  { %v3201_v15 = vpop.eup %3200  ;;  %v2317_v16 = vadd.f32 1.0, %v3199_v60 }
 0xa2d   :  { %v3203_v17 = vpop.eup %3202  ;;  %v2319_v18 = vadd.f32 1.0, %v3201_v15 }
 0xa2e   :  { %v3205_v19 = vpop.eup %3204  ;;  %3206 = vrcp.f32 %v2317_v16  ;;  %v2318_v20 = vadd.f32 1.0, %v3203_v17 }
 0xa2f   :  { %3208 = vrcp.f32 %v2319_v18  ;;  %v2320_v12 = vadd.f32 1.0, %v3205_v19 }
 0xa30   :  { %3210 = vrcp.f32 %v2318_v20 }
 0xa31   :  { %3212 = vrcp.f32 %v2320_v12 }
 0xa38   :  { %v3207_v25 = vpop.eup %3206 }
 0xa39   :  { %v3209_v26 = vpop.eup %3208  ;;  %v2329_v31 = vmul.f32 %v3207_v25, %v3199_v60 }
 0xa3a   :  { %v3211_v32 = vpop.eup %3210  ;;  %v2331_v33 = vmul.f32 %v3209_v26, %v3201_v15 }
 0xa3b   :  { %v3213_v34 = vpop.eup %3212  ;;  %v2333_v35 = vsel %vm2325_vm0, %v3207_v25, %v2329_v31  ;;  %v2330_v36 = vmul.f32 %v3211_v32, %v3203_v17 }
 0xa3c   :  { %v2337_v37 = vmax.f32 %v2333_v35, 0.0  ;;  %v2335_v38 = vsel %vm2327_vm1, %v3209_v26, %v2331_v33  ;;  %v2332_v39 = vmul.f32 %v3213_v34, %v3205_v19 }
 0xa3d   :  { %v2339_v40 = vmax.f32 %v2335_v38, 0.0  ;;  %v2334_v4 = vsel %vm2326_vm2, %v3211_v32, %v2330_v36 }
 0xa3e   :  { %v2341_v41 = vmin.f32 %v2337_v37, 1.0  ;;  %v2338_v42 = vmax.f32 %v2334_v4, 0.0  ;;  %v2336_v43 = vsel %vm2328_vm3, %v3213_v34, %v2332_v39 }
 0xa3f   :  { %v2343_v44 = vmin.f32 %v2339_v40, 1.0  ;;  %v2340_v3 = vmax.f32 %v2336_v43, 0.0 }
 0xa40   :  { %v2342_v45 = vmin.f32 %v2338_v42, 1.0 }
 0xa41   :  { %v2344_v2 = vmin.f32 %v2340_v3, 1.0 }
 0xa42   :  { %v2349_v46 = vcombine.low %v2341_v41, %v2342_v45 }
 0xa43   :  { %v2350_v1 = vcombine.low %v2343_v44, %v2344_v2 }
 0xa44   :  { %2353 = vst [vmem:[%s4111_s11] sm:$0xff] %v2349_v46 }
 0xa45   :  { %2354 = vst [vmem:[%s4111_s11 + $0x8] sm:$0xff] %v2350_v1 }
 0xa46   :  { %2359 = vsyncpa [#allocation3], 1 }
 0xa47   :  { %2360 = vsyncpa [#allocation5], 1 }
 0xa48   :  { %2361 = vsyncpa [#allocation8], 1 }

</bundles_post_ra>
